<compile_context>
chip_gen: v7x
topology: tpu7x:2x2x1
jax: 0.10.0
libtpu: 0.0.40
codegen_flags: <defaults>
</compile_context>

<pallas_src>
import jax
import jax.numpy as jnp
import numpy as np
from jax import lax
from jax.experimental import pallas as pl
from jax.experimental.pallas import tpu as pltpu

H_LSTM = 50   # real LSTM hidden size (fixed by the module)
HP = 64       # padded hidden size (lane-friendly)
GP = 64       # padded per-gate stride; fused gate width = 4*GP = 256 lanes
K = 3         # conv kernel size


# ------------------------------ fused kernel -------------------------------

def fused_forward_kernel(x_ref, w1_ref, b1_ref, wih_ref, bih_ref, whh_ref,
                         wd_ref, bd_ref, o_ref):
    # x_ref : (L, Bp, K*Cin)  time-major, batch-padded, im2col'd conv1 input
    # w1    : (K*Cin, C1)     b1 : (1, C1)
    # wih   : (K*C1, 4*GP)    fused (conv2 ∘ lstm input-proj) weight
    # bih   : (1, 4*GP)       fused (conv2 ∘ lstm input-proj) bias
    # whh   : (HP, 4*GP)
    # wd    : (HP, out)       fused (dense1 ∘ dense2) weight;  bd : (1, out)
    # o_ref : (B, out)
    L, Bp, KCin = x_ref.shape
    C1 = w1_ref.shape[1]
    G4 = wih_ref.shape[1]
    Gp = G4 // 4
    B_out = o_ref.shape[0]

    # ---- conv1: single im2col matmul on the MXU -------------------------
    x1 = x_ref[...].reshape(L * Bp, KCin)
    y1 = jnp.dot(x1, w1_ref[...], preferred_element_type=jnp.float32) + b1_ref[...]
    y1 = y1.reshape(L, Bp, C1)

    # ---- conv2 + LSTM input projection: 'same'-pad + im2col built in VMEM,
    #      ONE matmul against the pre-fused (W2 @ Wih) weight ---------------
    zpad = jnp.zeros((1, Bp, C1), jnp.float32)
    y1p = jnp.concatenate([zpad, y1, zpad], axis=0)                  # (L+2, Bp, C1)
    x2 = jnp.concatenate([y1p[k:k + L] for k in range(K)], axis=-1)  # (L, Bp, K*C1)
    gx = jnp.dot(x2.reshape(L * Bp, K * C1), wih_ref[...],
                 preferred_element_type=jnp.float32) + bih_ref[...]  # (L*Bp, 4*GP)
    gx = gx.reshape(L, Bp, G4)

    # ---- LSTM recurrence: only h @ W_hh on the serial path ---------------
    whh = whh_ref[...]                                               # (HP, 4*GP)
    h = jnp.zeros((Bp, Gp), jnp.float32)
    c = jnp.zeros((Bp, Gp), jnp.float32)
    # Pad gate lanes of W/b are zero -> pre-activations in pad lanes are
    # exactly 0, so c/h pad lanes stay 0 and never leak into real lanes.
    for t in range(L):  # L is small and fixed: full static unroll
        g = gx[t] + jnp.dot(h, whh, preferred_element_type=jnp.float32)  # (Bp, 4*GP)
        i_g = jax.nn.sigmoid(g[:, 0 * Gp:1 * Gp])
        f_g = jax.nn.sigmoid(g[:, 1 * Gp:2 * Gp])
        g_g = jnp.tanh(g[:, 2 * Gp:3 * Gp])
        o_g = jax.nn.sigmoid(g[:, 3 * Gp:4 * Gp])
        c = f_g * c + i_g * g_g
        h = o_g * jnp.tanh(c)

    # ---- MLP head: dense1∘dense2 pre-fused (no activation between them;
    #      Dropout(0.5) = identity at inference) ---------------------------
    out = jnp.dot(h, wd_ref[...], preferred_element_type=jnp.float32) + bd_ref[...]
    o_ref[...] = out[:B_out, :]


# --------------------------- one-time weight packing ------------------------

def pack_params(p):
    """Repack PyTorch-layout weights into the kernel's fused/padded layout.

    Done ONCE (outside the per-call forward) so the hot path is pure dispatch.
    Includes the algebraic fusions conv2∘lstm_ih and dense1∘dense2.
    """
    H = H_LSTM

    def conv_pack(w):  # (Cout, Cin, K) -> (K*Cin, Cout), row = k*Cin + cin
        return jnp.transpose(w, (2, 1, 0)).reshape(-1, w.shape[0]).astype(jnp.float32)

    w1 = conv_pack(p["conv1_w"])                                  # (K*Cin, 16)
    b1 = p["conv1_b"].reshape(1, -1).astype(jnp.float32)
    w2 = conv_pack(p["conv2_w"])                                  # (K*16, 32)
    b2 = p["conv2_b"].reshape(1, -1).astype(jnp.float32)

    def gate_pack(w, rows):  # (4H, I) -> (rows, 4*GP), gate k at lanes [k*GP, k*GP+H)
        out = jnp.zeros((rows, 4 * GP), jnp.float32)
        for k in range(4):
            blk = w[k * H:(k + 1) * H, :].T.astype(jnp.float32)   # (I, H)
            out = out.at[:blk.shape[0], k * GP:k * GP + H].set(blk)
        return out

    wih = gate_pack(p["lstm_w_ih"], p["lstm_w_ih"].shape[1])      # (32, 256)
    whh = gate_pack(p["lstm_w_hh"], HP)                           # (64, 256), rows 50..63 zero
    b_all = (p["lstm_b_ih"] + p["lstm_b_hh"]).astype(jnp.float32)
    bl = jnp.zeros((1, 4 * GP), jnp.float32)
    for k in range(4):
        bl = bl.at[0, k * GP:k * GP + H].set(b_all[k * H:(k + 1) * H])

    # Fold conv2 into the LSTM input projection (both linear, no nonlinearity
    # in between).  Pad lanes stay exactly zero because wih/bl pad lanes are 0.
    wih_c = (w2 @ wih).astype(jnp.float32)                        # (48, 256)
    bih_c = (b2 @ wih + bl).astype(jnp.float32)                   # (1, 256)

    # Fold dense1∘dense2 (the module has no activation between them).
    wd1 = jnp.zeros((HP, p["dense1_w"].shape[0]), jnp.float32)
    wd1 = wd1.at[:H, :].set(p["dense1_w"].T.astype(jnp.float32))  # pad rows zero
    bd1 = p["dense1_b"].reshape(1, -1).astype(jnp.float32)
    wd2 = p["dense2_w"].T.astype(jnp.float32)
    bd2 = p["dense2_b"].reshape(1, -1).astype(jnp.float32)
    wd = (wd1 @ wd2).astype(jnp.float32)                          # (HP, out), pad rows zero
    bd = (bd1 @ wd2 + bd2).astype(jnp.float32)                    # (1, out)

    return dict(w1=w1, b1=b1, wih=wih_c, bih=bih_c, whh=whh, wd=wd, bd=bd)


# ------------------------------- forward ------------------------------------

def conv1d_lstm_forward(x_bcl, packed):
    """x_bcl: PyTorch NCW input (B, C_in, L); packed: output of pack_params."""
    B, Cin, L = x_bcl.shape
    Bp = int(np.ceil(B / 8) * 8)  # pad batch to a full sublane tile

    # Time-major, batch-padded, conv1-'same'-padded, im2col'd input (tiny).
    x_lbc = jnp.transpose(x_bcl, (2, 0, 1)).astype(jnp.float32)            # (L, B, Cin)
    x_lbc = jnp.pad(x_lbc, ((1, 1), (0, Bp - B), (0, 0)))                  # (L+2, Bp, Cin)
    x_im2col = jnp.concatenate([x_lbc[k:k + L] for k in range(K)], axis=-1)  # (L, Bp, K*Cin)

    out_dim = packed["wd"].shape[1]
    vmem = lambda: pl.BlockSpec(memory_space=pltpu.MemorySpace.VMEM)
    # TODO(synk): for large batches add a grid over B with
    # dimension_semantics=("parallel",) to shard across TensorCores on v7x.
    return pl.pallas_call(
        fused_forward_kernel,
        out_shape=jax.ShapeDtypeStruct((B, out_dim), jnp.float32),
        in_specs=[vmem() for _ in range(8)],
        out_specs=vmem(),
    )(x_im2col, packed["w1"], packed["b1"], packed["wih"], packed["bih"],
      packed["whh"], packed["wd"], packed["bd"])


# --------------------------- pure-JAX reference ------------------------------

def ref_forward(x_bcl, p):
    def conv(x, w, b):
        y = lax.conv_general_dilated(x, w, window_strides=(1,), padding=[(1, 1)],
                                     dimension_numbers=("NCH", "OIH", "NCH"))
        return y + b[None, :, None]

    x = conv(x_bcl, p["conv1_w"], p["conv1_b"])
    x = conv(x, p["conv2_w"], p["conv2_b"])
    x = jnp.transpose(x, (0, 2, 1))                # (B, L, 32)

    def step(carry, x_t):
        h, c = carry
        gates = (x_t @ p["lstm_w_ih"].T + h @ p["lstm_w_hh"].T
                 + p["lstm_b_ih"] + p["lstm_b_hh"])
        i, f, g, o = jnp.split(gates, 4, axis=-1)
        c = jax.nn.sigmoid(f) * c + jax.nn.sigmoid(i) * jnp.tanh(g)
        h = jax.nn.sigmoid(o) * jnp.tanh(c)
        return (h, c), None

    B = x.shape[0]
    h0 = jnp.zeros((B, H_LSTM), jnp.float32)
    c0 = jnp.zeros((B, H_LSTM), jnp.float32)
    (h, _), _ = lax.scan(step, (h0, c0), jnp.transpose(x, (1, 0, 2)))
    z = h @ p["dense1_w"].T + p["dense1_b"]
    return z @ p["dense2_w"].T + p["dense2_b"]


# ---------------------------------- main -------------------------------------

if __name__ == "__main__":
    B, Cin, L, out_channel = 2, 1, 16, 2
    key = jax.random.PRNGKey(0)
    ks = jax.random.split(key, 13)

    def init(k, shape, fan_in):
        bound = 1.0 / np.sqrt(fan_in)
        return jax.random.uniform(k, shape, jnp.float32, -bound, bound)

    params = {
        "conv1_w": init(ks[0], (16, Cin, 3), Cin * 3),
        "conv1_b": init(ks[1], (16,), Cin * 3),
        "conv2_w": init(ks[2], (32, 16, 3), 16 * 3),
        "conv2_b": init(ks[3], (32,), 16 * 3),
        "lstm_w_ih": init(ks[4], (4 * H_LSTM, 32), H_LSTM),
        "lstm_w_hh": init(ks[5], (4 * H_LSTM, H_LSTM), H_LSTM),
        "lstm_b_ih": init(ks[6], (4 * H_LSTM,), H_LSTM),
        "lstm_b_hh": init(ks[7], (4 * H_LSTM,), H_LSTM),
        "dense1_w": init(ks[8], (32, H_LSTM), H_LSTM),
        "dense1_b": init(ks[9], (32,), H_LSTM),
        "dense2_w": init(ks[10], (out_channel, 32), 32),
        "dense2_b": init(ks[11], (out_channel,), 32),
    }
    x = jax.random.normal(ks[12], (B, Cin, L), jnp.float32)

    packed = jax.tree_util.tree_map(jax.block_until_ready, pack_params(params))
    fwd = jax.jit(conv1d_lstm_forward)

    out = jax.block_until_ready(fwd(x, packed))
    ref = jax.block_until_ready(ref_forward(x, params))
    np.testing.assert_allclose(np.asarray(out), np.asarray(ref), rtol=1e-4, atol=1e-4)
    print("KERNEL_OK")
</pallas_src>

<mosaic_0001>
module attributes {stable_mosaic.version = 11 : i64} {
  func.func @fused_forward_kernel(%arg0: memref<16x8x3xf32, #tpu.memory_space<vmem>>, %arg1: memref<3x16xf32, #tpu.memory_space<vmem>>, %arg2: memref<1x16xf32, #tpu.memory_space<vmem>>, %arg3: memref<48x256xf32, #tpu.memory_space<vmem>>, %arg4: memref<1x256xf32, #tpu.memory_space<vmem>>, %arg5: memref<64x256xf32, #tpu.memory_space<vmem>>, %arg6: memref<64x2xf32, #tpu.memory_space<vmem>>, %arg7: memref<1x2xf32, #tpu.memory_space<vmem>>, %arg8: memref<2x2xf32, #tpu.memory_space<vmem>>) attributes {dimension_semantics = [], scalar_prefetch = 0 : i64, scratch_operands = 0 : i64, tpu.core_type = #tpu.core_type<tc>} {
    %c0 = arith.constant 0 : index
    %c0_0 = arith.constant 0 : index
    %c0_1 = arith.constant 0 : index
    %0 = vector.load %arg0[%c0, %c0_0, %c0_1] : memref<16x8x3xf32, #tpu.memory_space<vmem>>, vector<16x8x3xf32>
    %1 = vector.shape_cast %0 : vector<16x8x3xf32> to vector<128x3xf32>
    %c0_2 = arith.constant 0 : index
    %c0_3 = arith.constant 0 : index
    %2 = vector.load %arg1[%c0_2, %c0_3] : memref<3x16xf32, #tpu.memory_space<vmem>>, vector<3x16xf32>
    %cst = arith.constant dense<0.000000e+00> : vector<128x16xf32>
    %3 = tpu.matmul %1, %2, %cst {dimension_numbers = #tpu.dot_dimension_numbers<[1], [0], [0], [1], [0, 0, 1, 1], [], []>} : vector<128x3xf32>, vector<3x16xf32>, vector<128x16xf32> -> vector<128x16xf32>
    %c0_4 = arith.constant 0 : index
    %c0_5 = arith.constant 0 : index
    %4 = vector.load %arg2[%c0_4, %c0_5] : memref<1x16xf32, #tpu.memory_space<vmem>>, vector<1x16xf32>
    %5 = vector.broadcast %4 : vector<1x16xf32> to vector<128x16xf32>
    %6 = arith.addf %3, %5 : vector<128x16xf32>
    %7 = vector.shape_cast %6 : vector<128x16xf32> to vector<16x8x16xf32>
    %cst_6 = arith.constant 0.000000e+00 : f32
    %8 = vector.broadcast %cst_6 : f32 to vector<1x8x16xf32>
    %9 = tpu.concatenate %8, %7, %8 in 0 : vector<1x8x16xf32>, vector<16x8x16xf32>, vector<1x8x16xf32> -> vector<18x8x16xf32>
    %10 = vector.extract_strided_slice %9 {offsets = [0, 0, 0], sizes = [16, 8, 16], strides = [1, 1, 1]} : vector<18x8x16xf32> to vector<16x8x16xf32>
    %11 = vector.extract_strided_slice %9 {offsets = [1, 0, 0], sizes = [16, 8, 16], strides = [1, 1, 1]} : vector<18x8x16xf32> to vector<16x8x16xf32>
    %12 = vector.extract_strided_slice %9 {offsets = [2, 0, 0], sizes = [16, 8, 16], strides = [1, 1, 1]} : vector<18x8x16xf32> to vector<16x8x16xf32>
    %13 = tpu.concatenate %10, %11, %12 in 2 : vector<16x8x16xf32>, vector<16x8x16xf32>, vector<16x8x16xf32> -> vector<16x8x48xf32>
    %14 = vector.shape_cast %13 : vector<16x8x48xf32> to vector<128x48xf32>
    %c0_7 = arith.constant 0 : index
    %c0_8 = arith.constant 0 : index
    %15 = vector.load %arg3[%c0_7, %c0_8] : memref<48x256xf32, #tpu.memory_space<vmem>>, vector<48x256xf32>
    %cst_9 = arith.constant dense<0.000000e+00> : vector<128x256xf32>
    %16 = tpu.matmul %14, %15, %cst_9 {dimension_numbers = #tpu.dot_dimension_numbers<[1], [0], [0], [1], [0, 0, 1, 1], [], []>} : vector<128x48xf32>, vector<48x256xf32>, vector<128x256xf32> -> vector<128x256xf32>
    %c0_10 = arith.constant 0 : index
    %c0_11 = arith.constant 0 : index
    %17 = vector.load %arg4[%c0_10, %c0_11] : memref<1x256xf32, #tpu.memory_space<vmem>>, vector<1x256xf32>
    %18 = vector.broadcast %17 : vector<1x256xf32> to vector<128x256xf32>
    %19 = arith.addf %16, %18 : vector<128x256xf32>
    %20 = vector.shape_cast %19 : vector<128x256xf32> to vector<16x8x256xf32>
    %c0_12 = arith.constant 0 : index
    %c0_13 = arith.constant 0 : index
    %21 = vector.load %arg5[%c0_12, %c0_13] : memref<64x256xf32, #tpu.memory_space<vmem>>, vector<64x256xf32>
    %cst_14 = arith.constant 0.000000e+00 : f32
    %22 = vector.broadcast %cst_14 : f32 to vector<8x64xf32>
    %cst_15 = arith.constant 0.000000e+00 : f32
    %23 = vector.broadcast %cst_15 : f32 to vector<8x64xf32>
    %24 = vector.extract_strided_slice %20 {offsets = [0, 0, 0], sizes = [1, 8, 256], strides = [1, 1, 1]} : vector<16x8x256xf32> to vector<1x8x256xf32>
    %25 = vector.shape_cast %24 : vector<1x8x256xf32> to vector<8x256xf32>
    %cst_16 = arith.constant dense<0.000000e+00> : vector<8x256xf32>
    %26 = tpu.matmul %22, %21, %cst_16 {dimension_numbers = #tpu.dot_dimension_numbers<[1], [0], [0], [1], [0, 0, 1, 1], [], []>} : vector<8x64xf32>, vector<64x256xf32>, vector<8x256xf32> -> vector<8x256xf32>
    %27 = arith.addf %25, %26 : vector<8x256xf32>
    %28 = vector.extract_strided_slice %27 {offsets = [0, 0], sizes = [8, 64], strides = [1, 1]} : vector<8x256xf32> to vector<8x64xf32>
    %29 = arith.negf %28 : vector<8x64xf32>
    %30 = math.exp %29 : vector<8x64xf32>
    %cst_17 = arith.constant 1.000000e+00 : f32
    %31 = vector.broadcast %cst_17 : f32 to vector<8x64xf32>
    %32 = arith.addf %31, %30 : vector<8x64xf32>
    %33 = arith.divf %31, %32 : vector<8x64xf32>
    %34 = vector.extract_strided_slice %27 {offsets = [0, 64], sizes = [8, 64], strides = [1, 1]} : vector<8x256xf32> to vector<8x64xf32>
    %35 = arith.negf %34 : vector<8x64xf32>
    %36 = math.exp %35 : vector<8x64xf32>
    %cst_18 = arith.constant 1.000000e+00 : f32
    %37 = vector.broadcast %cst_18 : f32 to vector<8x64xf32>
    %38 = arith.addf %37, %36 : vector<8x64xf32>
    %39 = arith.divf %37, %38 : vector<8x64xf32>
    %40 = vector.extract_strided_slice %27 {offsets = [0, 128], sizes = [8, 64], strides = [1, 1]} : vector<8x256xf32> to vector<8x64xf32>
    %41 = math.tanh %40 : vector<8x64xf32>
    %42 = vector.extract_strided_slice %27 {offsets = [0, 192], sizes = [8, 64], strides = [1, 1]} : vector<8x256xf32> to vector<8x64xf32>
    %43 = arith.negf %42 : vector<8x64xf32>
    %44 = math.exp %43 : vector<8x64xf32>
    %cst_19 = arith.constant 1.000000e+00 : f32
    %45 = vector.broadcast %cst_19 : f32 to vector<8x64xf32>
    %46 = arith.addf %45, %44 : vector<8x64xf32>
    %47 = arith.divf %45, %46 : vector<8x64xf32>
    %48 = arith.mulf %39, %23 : vector<8x64xf32>
    %49 = arith.mulf %33, %41 : vector<8x64xf32>
    %50 = arith.addf %48, %49 : vector<8x64xf32>
    %51 = math.tanh %50 : vector<8x64xf32>
    %52 = arith.mulf %47, %51 : vector<8x64xf32>
    %53 = vector.extract_strided_slice %20 {offsets = [1, 0, 0], sizes = [1, 8, 256], strides = [1, 1, 1]} : vector<16x8x256xf32> to vector<1x8x256xf32>
    %54 = vector.shape_cast %53 : vector<1x8x256xf32> to vector<8x256xf32>
    %cst_20 = arith.constant dense<0.000000e+00> : vector<8x256xf32>
    %55 = tpu.matmul %52, %21, %cst_20 {dimension_numbers = #tpu.dot_dimension_numbers<[1], [0], [0], [1], [0, 0, 1, 1], [], []>} : vector<8x64xf32>, vector<64x256xf32>, vector<8x256xf32> -> vector<8x256xf32>
    %56 = arith.addf %54, %55 : vector<8x256xf32>
    %57 = vector.extract_strided_slice %56 {offsets = [0, 0], sizes = [8, 64], strides = [1, 1]} : vector<8x256xf32> to vector<8x64xf32>
    %58 = arith.negf %57 : vector<8x64xf32>
    %59 = math.exp %58 : vector<8x64xf32>
    %cst_21 = arith.constant 1.000000e+00 : f32
    %60 = vector.broadcast %cst_21 : f32 to vector<8x64xf32>
    %61 = arith.addf %60, %59 : vector<8x64xf32>
    %62 = arith.divf %60, %61 : vector<8x64xf32>
    %63 = vector.extract_strided_slice %56 {offsets = [0, 64], sizes = [8, 64], strides = [1, 1]} : vector<8x256xf32> to vector<8x64xf32>
    %64 = arith.negf %63 : vector<8x64xf32>
    %65 = math.exp %64 : vector<8x64xf32>
    %cst_22 = arith.constant 1.000000e+00 : f32
    %66 = vector.broadcast %cst_22 : f32 to vector<8x64xf32>
    %67 = arith.addf %66, %65 : vector<8x64xf32>
    %68 = arith.divf %66, %67 : vector<8x64xf32>
    %69 = vector.extract_strided_slice %56 {offsets = [0, 128], sizes = [8, 64], strides = [1, 1]} : vector<8x256xf32> to vector<8x64xf32>
    %70 = math.tanh %69 : vector<8x64xf32>
    %71 = vector.extract_strided_slice %56 {offsets = [0, 192], sizes = [8, 64], strides = [1, 1]} : vector<8x256xf32> to vector<8x64xf32>
    %72 = arith.negf %71 : vector<8x64xf32>
    %73 = math.exp %72 : vector<8x64xf32>
    %cst_23 = arith.constant 1.000000e+00 : f32
    %74 = vector.broadcast %cst_23 : f32 to vector<8x64xf32>
    %75 = arith.addf %74, %73 : vector<8x64xf32>
    %76 = arith.divf %74, %75 : vector<8x64xf32>
    %77 = arith.mulf %68, %50 : vector<8x64xf32>
    %78 = arith.mulf %62, %70 : vector<8x64xf32>
    %79 = arith.addf %77, %78 : vector<8x64xf32>
    %80 = math.tanh %79 : vector<8x64xf32>
    %81 = arith.mulf %76, %80 : vector<8x64xf32>
    %82 = vector.extract_strided_slice %20 {offsets = [2, 0, 0], sizes = [1, 8, 256], strides = [1, 1, 1]} : vector<16x8x256xf32> to vector<1x8x256xf32>
    %83 = vector.shape_cast %82 : vector<1x8x256xf32> to vector<8x256xf32>
    %cst_24 = arith.constant dense<0.000000e+00> : vector<8x256xf32>
    %84 = tpu.matmul %81, %21, %cst_24 {dimension_numbers = #tpu.dot_dimension_numbers<[1], [0], [0], [1], [0, 0, 1, 1], [], []>} : vector<8x64xf32>, vector<64x256xf32>, vector<8x256xf32> -> vector<8x256xf32>
    %85 = arith.addf %83, %84 : vector<8x256xf32>
    %86 = vector.extract_strided_slice %85 {offsets = [0, 0], sizes = [8, 64], strides = [1, 1]} : vector<8x256xf32> to vector<8x64xf32>
    %87 = arith.negf %86 : vector<8x64xf32>
    %88 = math.exp %87 : vector<8x64xf32>
    %cst_25 = arith.constant 1.000000e+00 : f32
    %89 = vector.broadcast %cst_25 : f32 to vector<8x64xf32>
    %90 = arith.addf %89, %88 : vector<8x64xf32>
    %91 = arith.divf %89, %90 : vector<8x64xf32>
    %92 = vector.extract_strided_slice %85 {offsets = [0, 64], sizes = [8, 64], strides = [1, 1]} : vector<8x256xf32> to vector<8x64xf32>
    %93 = arith.negf %92 : vector<8x64xf32>
    %94 = math.exp %93 : vector<8x64xf32>
    %cst_26 = arith.constant 1.000000e+00 : f32
    %95 = vector.broadcast %cst_26 : f32 to vector<8x64xf32>
    %96 = arith.addf %95, %94 : vector<8x64xf32>
    %97 = arith.divf %95, %96 : vector<8x64xf32>
    %98 = vector.extract_strided_slice %85 {offsets = [0, 128], sizes = [8, 64], strides = [1, 1]} : vector<8x256xf32> to vector<8x64xf32>
    %99 = math.tanh %98 : vector<8x64xf32>
    %100 = vector.extract_strided_slice %85 {offsets = [0, 192], sizes = [8, 64], strides = [1, 1]} : vector<8x256xf32> to vector<8x64xf32>
    %101 = arith.negf %100 : vector<8x64xf32>
    %102 = math.exp %101 : vector<8x64xf32>
    %cst_27 = arith.constant 1.000000e+00 : f32
    %103 = vector.broadcast %cst_27 : f32 to vector<8x64xf32>
    %104 = arith.addf %103, %102 : vector<8x64xf32>
    %105 = arith.divf %103, %104 : vector<8x64xf32>
    %106 = arith.mulf %97, %79 : vector<8x64xf32>
    %107 = arith.mulf %91, %99 : vector<8x64xf32>
    %108 = arith.addf %106, %107 : vector<8x64xf32>
    %109 = math.tanh %108 : vector<8x64xf32>
    %110 = arith.mulf %105, %109 : vector<8x64xf32>
    %111 = vector.extract_strided_slice %20 {offsets = [3, 0, 0], sizes = [1, 8, 256], strides = [1, 1, 1]} : vector<16x8x256xf32> to vector<1x8x256xf32>
    %112 = vector.shape_cast %111 : vector<1x8x256xf32> to vector<8x256xf32>
    %cst_28 = arith.constant dense<0.000000e+00> : vector<8x256xf32>
    %113 = tpu.matmul %110, %21, %cst_28 {dimension_numbers = #tpu.dot_dimension_numbers<[1], [0], [0], [1], [0, 0, 1, 1], [], []>} : vector<8x64xf32>, vector<64x256xf32>, vector<8x256xf32> -> vector<8x256xf32>
    %114 = arith.addf %112, %113 : vector<8x256xf32>
    %115 = vector.extract_strided_slice %114 {offsets = [0, 0], sizes = [8, 64], strides = [1, 1]} : vector<8x256xf32> to vector<8x64xf32>
    %116 = arith.negf %115 : vector<8x64xf32>
    %117 = math.exp %116 : vector<8x64xf32>
    %cst_29 = arith.constant 1.000000e+00 : f32
    %118 = vector.broadcast %cst_29 : f32 to vector<8x64xf32>
    %119 = arith.addf %118, %117 : vector<8x64xf32>
    %120 = arith.divf %118, %119 : vector<8x64xf32>
    %121 = vector.extract_strided_slice %114 {offsets = [0, 64], sizes = [8, 64], strides = [1, 1]} : vector<8x256xf32> to vector<8x64xf32>
    %122 = arith.negf %121 : vector<8x64xf32>
    %123 = math.exp %122 : vector<8x64xf32>
    %cst_30 = arith.constant 1.000000e+00 : f32
    %124 = vector.broadcast %cst_30 : f32 to vector<8x64xf32>
    %125 = arith.addf %124, %123 : vector<8x64xf32>
    %126 = arith.divf %124, %125 : vector<8x64xf32>
    %127 = vector.extract_strided_slice %114 {offsets = [0, 128], sizes = [8, 64], strides = [1, 1]} : vector<8x256xf32> to vector<8x64xf32>
    %128 = math.tanh %127 : vector<8x64xf32>
    %129 = vector.extract_strided_slice %114 {offsets = [0, 192], sizes = [8, 64], strides = [1, 1]} : vector<8x256xf32> to vector<8x64xf32>
    %130 = arith.negf %129 : vector<8x64xf32>
    %131 = math.exp %130 : vector<8x64xf32>
    %cst_31 = arith.constant 1.000000e+00 : f32
    %132 = vector.broadcast %cst_31 : f32 to vector<8x64xf32>
    %133 = arith.addf %132, %131 : vector<8x64xf32>
    %134 = arith.divf %132, %133 : vector<8x64xf32>
    %135 = arith.mulf %126, %108 : vector<8x64xf32>
    %136 = arith.mulf %120, %128 : vector<8x64xf32>
    %137 = arith.addf %135, %136 : vector<8x64xf32>
    %138 = math.tanh %137 : vector<8x64xf32>
    %139 = arith.mulf %134, %138 : vector<8x64xf32>
    %140 = vector.extract_strided_slice %20 {offsets = [4, 0, 0], sizes = [1, 8, 256], strides = [1, 1, 1]} : vector<16x8x256xf32> to vector<1x8x256xf32>
    %141 = vector.shape_cast %140 : vector<1x8x256xf32> to vector<8x256xf32>
    %cst_32 = arith.constant dense<0.000000e+00> : vector<8x256xf32>
    %142 = tpu.matmul %139, %21, %cst_32 {dimension_numbers = #tpu.dot_dimension_numbers<[1], [0], [0], [1], [0, 0, 1, 1], [], []>} : vector<8x64xf32>, vector<64x256xf32>, vector<8x256xf32> -> vector<8x256xf32>
    %143 = arith.addf %141, %142 : vector<8x256xf32>
    %144 = vector.extract_strided_slice %143 {offsets = [0, 0], sizes = [8, 64], strides = [1, 1]} : vector<8x256xf32> to vector<8x64xf32>
    %145 = arith.negf %144 : vector<8x64xf32>
    %146 = math.exp %145 : vector<8x64xf32>
    %cst_33 = arith.constant 1.000000e+00 : f32
    %147 = vector.broadcast %cst_33 : f32 to vector<8x64xf32>
    %148 = arith.addf %147, %146 : vector<8x64xf32>
    %149 = arith.divf %147, %148 : vector<8x64xf32>
    %150 = vector.extract_strided_slice %143 {offsets = [0, 64], sizes = [8, 64], strides = [1, 1]} : vector<8x256xf32> to vector<8x64xf32>
    %151 = arith.negf %150 : vector<8x64xf32>
    %152 = math.exp %151 : vector<8x64xf32>
    %cst_34 = arith.constant 1.000000e+00 : f32
    %153 = vector.broadcast %cst_34 : f32 to vector<8x64xf32>
    %154 = arith.addf %153, %152 : vector<8x64xf32>
    %155 = arith.divf %153, %154 : vector<8x64xf32>
    %156 = vector.extract_strided_slice %143 {offsets = [0, 128], sizes = [8, 64], strides = [1, 1]} : vector<8x256xf32> to vector<8x64xf32>
    %157 = math.tanh %156 : vector<8x64xf32>
    %158 = vector.extract_strided_slice %143 {offsets = [0, 192], sizes = [8, 64], strides = [1, 1]} : vector<8x256xf32> to vector<8x64xf32>
    %159 = arith.negf %158 : vector<8x64xf32>
    %160 = math.exp %159 : vector<8x64xf32>
    %cst_35 = arith.constant 1.000000e+00 : f32
    %161 = vector.broadcast %cst_35 : f32 to vector<8x64xf32>
    %162 = arith.addf %161, %160 : vector<8x64xf32>
    %163 = arith.divf %161, %162 : vector<8x64xf32>
    %164 = arith.mulf %155, %137 : vector<8x64xf32>
    %165 = arith.mulf %149, %157 : vector<8x64xf32>
    %166 = arith.addf %164, %165 : vector<8x64xf32>
    %167 = math.tanh %166 : vector<8x64xf32>
    %168 = arith.mulf %163, %167 : vector<8x64xf32>
    %169 = vector.extract_strided_slice %20 {offsets = [5, 0, 0], sizes = [1, 8, 256], strides = [1, 1, 1]} : vector<16x8x256xf32> to vector<1x8x256xf32>
    %170 = vector.shape_cast %169 : vector<1x8x256xf32> to vector<8x256xf32>
    %cst_36 = arith.constant dense<0.000000e+00> : vector<8x256xf32>
    %171 = tpu.matmul %168, %21, %cst_36 {dimension_numbers = #tpu.dot_dimension_numbers<[1], [0], [0], [1], [0, 0, 1, 1], [], []>} : vector<8x64xf32>, vector<64x256xf32>, vector<8x256xf32> -> vector<8x256xf32>
    %172 = arith.addf %170, %171 : vector<8x256xf32>
    %173 = vector.extract_strided_slice %172 {offsets = [0, 0], sizes = [8, 64], strides = [1, 1]} : vector<8x256xf32> to vector<8x64xf32>
    %174 = arith.negf %173 : vector<8x64xf32>
    %175 = math.exp %174 : vector<8x64xf32>
    %cst_37 = arith.constant 1.000000e+00 : f32
    %176 = vector.broadcast %cst_37 : f32 to vector<8x64xf32>
    %177 = arith.addf %176, %175 : vector<8x64xf32>
    %178 = arith.divf %176, %177 : vector<8x64xf32>
    %179 = vector.extract_strided_slice %172 {offsets = [0, 64], sizes = [8, 64], strides = [1, 1]} : vector<8x256xf32> to vector<8x64xf32>
    %180 = arith.negf %179 : vector<8x64xf32>
    %181 = math.exp %180 : vector<8x64xf32>
    %cst_38 = arith.constant 1.000000e+00 : f32
    %182 = vector.broadcast %cst_38 : f32 to vector<8x64xf32>
    %183 = arith.addf %182, %181 : vector<8x64xf32>
    %184 = arith.divf %182, %183 : vector<8x64xf32>
    %185 = vector.extract_strided_slice %172 {offsets = [0, 128], sizes = [8, 64], strides = [1, 1]} : vector<8x256xf32> to vector<8x64xf32>
    %186 = math.tanh %185 : vector<8x64xf32>
    %187 = vector.extract_strided_slice %172 {offsets = [0, 192], sizes = [8, 64], strides = [1, 1]} : vector<8x256xf32> to vector<8x64xf32>
    %188 = arith.negf %187 : vector<8x64xf32>
    %189 = math.exp %188 : vector<8x64xf32>
    %cst_39 = arith.constant 1.000000e+00 : f32
    %190 = vector.broadcast %cst_39 : f32 to vector<8x64xf32>
    %191 = arith.addf %190, %189 : vector<8x64xf32>
    %192 = arith.divf %190, %191 : vector<8x64xf32>
    %193 = arith.mulf %184, %166 : vector<8x64xf32>
    %194 = arith.mulf %178, %186 : vector<8x64xf32>
    %195 = arith.addf %193, %194 : vector<8x64xf32>
    %196 = math.tanh %195 : vector<8x64xf32>
    %197 = arith.mulf %192, %196 : vector<8x64xf32>
    %198 = vector.extract_strided_slice %20 {offsets = [6, 0, 0], sizes = [1, 8, 256], strides = [1, 1, 1]} : vector<16x8x256xf32> to vector<1x8x256xf32>
    %199 = vector.shape_cast %198 : vector<1x8x256xf32> to vector<8x256xf32>
    %cst_40 = arith.constant dense<0.000000e+00> : vector<8x256xf32>
    %200 = tpu.matmul %197, %21, %cst_40 {dimension_numbers = #tpu.dot_dimension_numbers<[1], [0], [0], [1], [0, 0, 1, 1], [], []>} : vector<8x64xf32>, vector<64x256xf32>, vector<8x256xf32> -> vector<8x256xf32>
    %201 = arith.addf %199, %200 : vector<8x256xf32>
    %202 = vector.extract_strided_slice %201 {offsets = [0, 0], sizes = [8, 64], strides = [1, 1]} : vector<8x256xf32> to vector<8x64xf32>
    %203 = arith.negf %202 : vector<8x64xf32>
    %204 = math.exp %203 : vector<8x64xf32>
    %cst_41 = arith.constant 1.000000e+00 : f32
    %205 = vector.broadcast %cst_41 : f32 to vector<8x64xf32>
    %206 = arith.addf %205, %204 : vector<8x64xf32>
    %207 = arith.divf %205, %206 : vector<8x64xf32>
    %208 = vector.extract_strided_slice %201 {offsets = [0, 64], sizes = [8, 64], strides = [1, 1]} : vector<8x256xf32> to vector<8x64xf32>
    %209 = arith.negf %208 : vector<8x64xf32>
    %210 = math.exp %209 : vector<8x64xf32>
    %cst_42 = arith.constant 1.000000e+00 : f32
    %211 = vector.broadcast %cst_42 : f32 to vector<8x64xf32>
    %212 = arith.addf %211, %210 : vector<8x64xf32>
    %213 = arith.divf %211, %212 : vector<8x64xf32>
    %214 = vector.extract_strided_slice %201 {offsets = [0, 128], sizes = [8, 64], strides = [1, 1]} : vector<8x256xf32> to vector<8x64xf32>
    %215 = math.tanh %214 : vector<8x64xf32>
    %216 = vector.extract_strided_slice %201 {offsets = [0, 192], sizes = [8, 64], strides = [1, 1]} : vector<8x256xf32> to vector<8x64xf32>
    %217 = arith.negf %216 : vector<8x64xf32>
    %218 = math.exp %217 : vector<8x64xf32>
    %cst_43 = arith.constant 1.000000e+00 : f32
    %219 = vector.broadcast %cst_43 : f32 to vector<8x64xf32>
    %220 = arith.addf %219, %218 : vector<8x64xf32>
    %221 = arith.divf %219, %220 : vector<8x64xf32>
    %222 = arith.mulf %213, %195 : vector<8x64xf32>
    %223 = arith.mulf %207, %215 : vector<8x64xf32>
    %224 = arith.addf %222, %223 : vector<8x64xf32>
    %225 = math.tanh %224 : vector<8x64xf32>
    %226 = arith.mulf %221, %225 : vector<8x64xf32>
    %227 = vector.extract_strided_slice %20 {offsets = [7, 0, 0], sizes = [1, 8, 256], strides = [1, 1, 1]} : vector<16x8x256xf32> to vector<1x8x256xf32>
    %228 = vector.shape_cast %227 : vector<1x8x256xf32> to vector<8x256xf32>
    %cst_44 = arith.constant dense<0.000000e+00> : vector<8x256xf32>
    %229 = tpu.matmul %226, %21, %cst_44 {dimension_numbers = #tpu.dot_dimension_numbers<[1], [0], [0], [1], [0, 0, 1, 1], [], []>} : vector<8x64xf32>, vector<64x256xf32>, vector<8x256xf32> -> vector<8x256xf32>
    %230 = arith.addf %228, %229 : vector<8x256xf32>
    %231 = vector.extract_strided_slice %230 {offsets = [0, 0], sizes = [8, 64], strides = [1, 1]} : vector<8x256xf32> to vector<8x64xf32>
    %232 = arith.negf %231 : vector<8x64xf32>
    %233 = math.exp %232 : vector<8x64xf32>
    %cst_45 = arith.constant 1.000000e+00 : f32
    %234 = vector.broadcast %cst_45 : f32 to vector<8x64xf32>
    %235 = arith.addf %234, %233 : vector<8x64xf32>
    %236 = arith.divf %234, %235 : vector<8x64xf32>
    %237 = vector.extract_strided_slice %230 {offsets = [0, 64], sizes = [8, 64], strides = [1, 1]} : vector<8x256xf32> to vector<8x64xf32>
    %238 = arith.negf %237 : vector<8x64xf32>
    %239 = math.exp %238 : vector<8x64xf32>
    %cst_46 = arith.constant 1.000000e+00 : f32
    %240 = vector.broadcast %cst_46 : f32 to vector<8x64xf32>
    %241 = arith.addf %240, %239 : vector<8x64xf32>
    %242 = arith.divf %240, %241 : vector<8x64xf32>
    %243 = vector.extract_strided_slice %230 {offsets = [0, 128], sizes = [8, 64], strides = [1, 1]} : vector<8x256xf32> to vector<8x64xf32>
    %244 = math.tanh %243 : vector<8x64xf32>
    %245 = vector.extract_strided_slice %230 {offsets = [0, 192], sizes = [8, 64], strides = [1, 1]} : vector<8x256xf32> to vector<8x64xf32>
    %246 = arith.negf %245 : vector<8x64xf32>
    %247 = math.exp %246 : vector<8x64xf32>
    %cst_47 = arith.constant 1.000000e+00 : f32
    %248 = vector.broadcast %cst_47 : f32 to vector<8x64xf32>
    %249 = arith.addf %248, %247 : vector<8x64xf32>
    %250 = arith.divf %248, %249 : vector<8x64xf32>
    %251 = arith.mulf %242, %224 : vector<8x64xf32>
    %252 = arith.mulf %236, %244 : vector<8x64xf32>
    %253 = arith.addf %251, %252 : vector<8x64xf32>
    %254 = math.tanh %253 : vector<8x64xf32>
    %255 = arith.mulf %250, %254 : vector<8x64xf32>
    %256 = vector.extract_strided_slice %20 {offsets = [8, 0, 0], sizes = [1, 8, 256], strides = [1, 1, 1]} : vector<16x8x256xf32> to vector<1x8x256xf32>
    %257 = vector.shape_cast %256 : vector<1x8x256xf32> to vector<8x256xf32>
    %cst_48 = arith.constant dense<0.000000e+00> : vector<8x256xf32>
    %258 = tpu.matmul %255, %21, %cst_48 {dimension_numbers = #tpu.dot_dimension_numbers<[1], [0], [0], [1], [0, 0, 1, 1], [], []>} : vector<8x64xf32>, vector<64x256xf32>, vector<8x256xf32> -> vector<8x256xf32>
    %259 = arith.addf %257, %258 : vector<8x256xf32>
    %260 = vector.extract_strided_slice %259 {offsets = [0, 0], sizes = [8, 64], strides = [1, 1]} : vector<8x256xf32> to vector<8x64xf32>
    %261 = arith.negf %260 : vector<8x64xf32>
    %262 = math.exp %261 : vector<8x64xf32>
    %cst_49 = arith.constant 1.000000e+00 : f32
    %263 = vector.broadcast %cst_49 : f32 to vector<8x64xf32>
    %264 = arith.addf %263, %262 : vector<8x64xf32>
    %265 = arith.divf %263, %264 : vector<8x64xf32>
    %266 = vector.extract_strided_slice %259 {offsets = [0, 64], sizes = [8, 64], strides = [1, 1]} : vector<8x256xf32> to vector<8x64xf32>
    %267 = arith.negf %266 : vector<8x64xf32>
    %268 = math.exp %267 : vector<8x64xf32>
    %cst_50 = arith.constant 1.000000e+00 : f32
    %269 = vector.broadcast %cst_50 : f32 to vector<8x64xf32>
    %270 = arith.addf %269, %268 : vector<8x64xf32>
    %271 = arith.divf %269, %270 : vector<8x64xf32>
    %272 = vector.extract_strided_slice %259 {offsets = [0, 128], sizes = [8, 64], strides = [1, 1]} : vector<8x256xf32> to vector<8x64xf32>
    %273 = math.tanh %272 : vector<8x64xf32>
    %274 = vector.extract_strided_slice %259 {offsets = [0, 192], sizes = [8, 64], strides = [1, 1]} : vector<8x256xf32> to vector<8x64xf32>
    %275 = arith.negf %274 : vector<8x64xf32>
    %276 = math.exp %275 : vector<8x64xf32>
    %cst_51 = arith.constant 1.000000e+00 : f32
    %277 = vector.broadcast %cst_51 : f32 to vector<8x64xf32>
    %278 = arith.addf %277, %276 : vector<8x64xf32>
    %279 = arith.divf %277, %278 : vector<8x64xf32>
    %280 = arith.mulf %271, %253 : vector<8x64xf32>
    %281 = arith.mulf %265, %273 : vector<8x64xf32>
    %282 = arith.addf %280, %281 : vector<8x64xf32>
    %283 = math.tanh %282 : vector<8x64xf32>
    %284 = arith.mulf %279, %283 : vector<8x64xf32>
    %285 = vector.extract_strided_slice %20 {offsets = [9, 0, 0], sizes = [1, 8, 256], strides = [1, 1, 1]} : vector<16x8x256xf32> to vector<1x8x256xf32>
    %286 = vector.shape_cast %285 : vector<1x8x256xf32> to vector<8x256xf32>
    %cst_52 = arith.constant dense<0.000000e+00> : vector<8x256xf32>
    %287 = tpu.matmul %284, %21, %cst_52 {dimension_numbers = #tpu.dot_dimension_numbers<[1], [0], [0], [1], [0, 0, 1, 1], [], []>} : vector<8x64xf32>, vector<64x256xf32>, vector<8x256xf32> -> vector<8x256xf32>
    %288 = arith.addf %286, %287 : vector<8x256xf32>
    %289 = vector.extract_strided_slice %288 {offsets = [0, 0], sizes = [8, 64], strides = [1, 1]} : vector<8x256xf32> to vector<8x64xf32>
    %290 = arith.negf %289 : vector<8x64xf32>
    %291 = math.exp %290 : vector<8x64xf32>
    %cst_53 = arith.constant 1.000000e+00 : f32
    %292 = vector.broadcast %cst_53 : f32 to vector<8x64xf32>
    %293 = arith.addf %292, %291 : vector<8x64xf32>
    %294 = arith.divf %292, %293 : vector<8x64xf32>
    %295 = vector.extract_strided_slice %288 {offsets = [0, 64], sizes = [8, 64], strides = [1, 1]} : vector<8x256xf32> to vector<8x64xf32>
    %296 = arith.negf %295 : vector<8x64xf32>
    %297 = math.exp %296 : vector<8x64xf32>
    %cst_54 = arith.constant 1.000000e+00 : f32
    %298 = vector.broadcast %cst_54 : f32 to vector<8x64xf32>
    %299 = arith.addf %298, %297 : vector<8x64xf32>
    %300 = arith.divf %298, %299 : vector<8x64xf32>
    %301 = vector.extract_strided_slice %288 {offsets = [0, 128], sizes = [8, 64], strides = [1, 1]} : vector<8x256xf32> to vector<8x64xf32>
    %302 = math.tanh %301 : vector<8x64xf32>
    %303 = vector.extract_strided_slice %288 {offsets = [0, 192], sizes = [8, 64], strides = [1, 1]} : vector<8x256xf32> to vector<8x64xf32>
    %304 = arith.negf %303 : vector<8x64xf32>
    %305 = math.exp %304 : vector<8x64xf32>
    %cst_55 = arith.constant 1.000000e+00 : f32
    %306 = vector.broadcast %cst_55 : f32 to vector<8x64xf32>
    %307 = arith.addf %306, %305 : vector<8x64xf32>
    %308 = arith.divf %306, %307 : vector<8x64xf32>
    %309 = arith.mulf %300, %282 : vector<8x64xf32>
    %310 = arith.mulf %294, %302 : vector<8x64xf32>
    %311 = arith.addf %309, %310 : vector<8x64xf32>
    %312 = math.tanh %311 : vector<8x64xf32>
    %313 = arith.mulf %308, %312 : vector<8x64xf32>
    %314 = vector.extract_strided_slice %20 {offsets = [10, 0, 0], sizes = [1, 8, 256], strides = [1, 1, 1]} : vector<16x8x256xf32> to vector<1x8x256xf32>
    %315 = vector.shape_cast %314 : vector<1x8x256xf32> to vector<8x256xf32>
    %cst_56 = arith.constant dense<0.000000e+00> : vector<8x256xf32>
    %316 = tpu.matmul %313, %21, %cst_56 {dimension_numbers = #tpu.dot_dimension_numbers<[1], [0], [0], [1], [0, 0, 1, 1], [], []>} : vector<8x64xf32>, vector<64x256xf32>, vector<8x256xf32> -> vector<8x256xf32>
    %317 = arith.addf %315, %316 : vector<8x256xf32>
    %318 = vector.extract_strided_slice %317 {offsets = [0, 0], sizes = [8, 64], strides = [1, 1]} : vector<8x256xf32> to vector<8x64xf32>
    %319 = arith.negf %318 : vector<8x64xf32>
    %320 = math.exp %319 : vector<8x64xf32>
    %cst_57 = arith.constant 1.000000e+00 : f32
    %321 = vector.broadcast %cst_57 : f32 to vector<8x64xf32>
    %322 = arith.addf %321, %320 : vector<8x64xf32>
    %323 = arith.divf %321, %322 : vector<8x64xf32>
    %324 = vector.extract_strided_slice %317 {offsets = [0, 64], sizes = [8, 64], strides = [1, 1]} : vector<8x256xf32> to vector<8x64xf32>
    %325 = arith.negf %324 : vector<8x64xf32>
    %326 = math.exp %325 : vector<8x64xf32>
    %cst_58 = arith.constant 1.000000e+00 : f32
    %327 = vector.broadcast %cst_58 : f32 to vector<8x64xf32>
    %328 = arith.addf %327, %326 : vector<8x64xf32>
    %329 = arith.divf %327, %328 : vector<8x64xf32>
    %330 = vector.extract_strided_slice %317 {offsets = [0, 128], sizes = [8, 64], strides = [1, 1]} : vector<8x256xf32> to vector<8x64xf32>
    %331 = math.tanh %330 : vector<8x64xf32>
    %332 = vector.extract_strided_slice %317 {offsets = [0, 192], sizes = [8, 64], strides = [1, 1]} : vector<8x256xf32> to vector<8x64xf32>
    %333 = arith.negf %332 : vector<8x64xf32>
    %334 = math.exp %333 : vector<8x64xf32>
    %cst_59 = arith.constant 1.000000e+00 : f32
    %335 = vector.broadcast %cst_59 : f32 to vector<8x64xf32>
    %336 = arith.addf %335, %334 : vector<8x64xf32>
    %337 = arith.divf %335, %336 : vector<8x64xf32>
    %338 = arith.mulf %329, %311 : vector<8x64xf32>
    %339 = arith.mulf %323, %331 : vector<8x64xf32>
    %340 = arith.addf %338, %339 : vector<8x64xf32>
    %341 = math.tanh %340 : vector<8x64xf32>
    %342 = arith.mulf %337, %341 : vector<8x64xf32>
    %343 = vector.extract_strided_slice %20 {offsets = [11, 0, 0], sizes = [1, 8, 256], strides = [1, 1, 1]} : vector<16x8x256xf32> to vector<1x8x256xf32>
    %344 = vector.shape_cast %343 : vector<1x8x256xf32> to vector<8x256xf32>
    %cst_60 = arith.constant dense<0.000000e+00> : vector<8x256xf32>
    %345 = tpu.matmul %342, %21, %cst_60 {dimension_numbers = #tpu.dot_dimension_numbers<[1], [0], [0], [1], [0, 0, 1, 1], [], []>} : vector<8x64xf32>, vector<64x256xf32>, vector<8x256xf32> -> vector<8x256xf32>
    %346 = arith.addf %344, %345 : vector<8x256xf32>
    %347 = vector.extract_strided_slice %346 {offsets = [0, 0], sizes = [8, 64], strides = [1, 1]} : vector<8x256xf32> to vector<8x64xf32>
    %348 = arith.negf %347 : vector<8x64xf32>
    %349 = math.exp %348 : vector<8x64xf32>
    %cst_61 = arith.constant 1.000000e+00 : f32
    %350 = vector.broadcast %cst_61 : f32 to vector<8x64xf32>
    %351 = arith.addf %350, %349 : vector<8x64xf32>
    %352 = arith.divf %350, %351 : vector<8x64xf32>
    %353 = vector.extract_strided_slice %346 {offsets = [0, 64], sizes = [8, 64], strides = [1, 1]} : vector<8x256xf32> to vector<8x64xf32>
    %354 = arith.negf %353 : vector<8x64xf32>
    %355 = math.exp %354 : vector<8x64xf32>
    %cst_62 = arith.constant 1.000000e+00 : f32
    %356 = vector.broadcast %cst_62 : f32 to vector<8x64xf32>
    %357 = arith.addf %356, %355 : vector<8x64xf32>
    %358 = arith.divf %356, %357 : vector<8x64xf32>
    %359 = vector.extract_strided_slice %346 {offsets = [0, 128], sizes = [8, 64], strides = [1, 1]} : vector<8x256xf32> to vector<8x64xf32>
    %360 = math.tanh %359 : vector<8x64xf32>
    %361 = vector.extract_strided_slice %346 {offsets = [0, 192], sizes = [8, 64], strides = [1, 1]} : vector<8x256xf32> to vector<8x64xf32>
    %362 = arith.negf %361 : vector<8x64xf32>
    %363 = math.exp %362 : vector<8x64xf32>
    %cst_63 = arith.constant 1.000000e+00 : f32
    %364 = vector.broadcast %cst_63 : f32 to vector<8x64xf32>
    %365 = arith.addf %364, %363 : vector<8x64xf32>
    %366 = arith.divf %364, %365 : vector<8x64xf32>
    %367 = arith.mulf %358, %340 : vector<8x64xf32>
    %368 = arith.mulf %352, %360 : vector<8x64xf32>
    %369 = arith.addf %367, %368 : vector<8x64xf32>
    %370 = math.tanh %369 : vector<8x64xf32>
    %371 = arith.mulf %366, %370 : vector<8x64xf32>
    %372 = vector.extract_strided_slice %20 {offsets = [12, 0, 0], sizes = [1, 8, 256], strides = [1, 1, 1]} : vector<16x8x256xf32> to vector<1x8x256xf32>
    %373 = vector.shape_cast %372 : vector<1x8x256xf32> to vector<8x256xf32>
    %cst_64 = arith.constant dense<0.000000e+00> : vector<8x256xf32>
    %374 = tpu.matmul %371, %21, %cst_64 {dimension_numbers = #tpu.dot_dimension_numbers<[1], [0], [0], [1], [0, 0, 1, 1], [], []>} : vector<8x64xf32>, vector<64x256xf32>, vector<8x256xf32> -> vector<8x256xf32>
    %375 = arith.addf %373, %374 : vector<8x256xf32>
    %376 = vector.extract_strided_slice %375 {offsets = [0, 0], sizes = [8, 64], strides = [1, 1]} : vector<8x256xf32> to vector<8x64xf32>
    %377 = arith.negf %376 : vector<8x64xf32>
    %378 = math.exp %377 : vector<8x64xf32>
    %cst_65 = arith.constant 1.000000e+00 : f32
    %379 = vector.broadcast %cst_65 : f32 to vector<8x64xf32>
    %380 = arith.addf %379, %378 : vector<8x64xf32>
    %381 = arith.divf %379, %380 : vector<8x64xf32>
    %382 = vector.extract_strided_slice %375 {offsets = [0, 64], sizes = [8, 64], strides = [1, 1]} : vector<8x256xf32> to vector<8x64xf32>
    %383 = arith.negf %382 : vector<8x64xf32>
    %384 = math.exp %383 : vector<8x64xf32>
    %cst_66 = arith.constant 1.000000e+00 : f32
    %385 = vector.broadcast %cst_66 : f32 to vector<8x64xf32>
    %386 = arith.addf %385, %384 : vector<8x64xf32>
    %387 = arith.divf %385, %386 : vector<8x64xf32>
    %388 = vector.extract_strided_slice %375 {offsets = [0, 128], sizes = [8, 64], strides = [1, 1]} : vector<8x256xf32> to vector<8x64xf32>
    %389 = math.tanh %388 : vector<8x64xf32>
    %390 = vector.extract_strided_slice %375 {offsets = [0, 192], sizes = [8, 64], strides = [1, 1]} : vector<8x256xf32> to vector<8x64xf32>
    %391 = arith.negf %390 : vector<8x64xf32>
    %392 = math.exp %391 : vector<8x64xf32>
    %cst_67 = arith.constant 1.000000e+00 : f32
    %393 = vector.broadcast %cst_67 : f32 to vector<8x64xf32>
    %394 = arith.addf %393, %392 : vector<8x64xf32>
    %395 = arith.divf %393, %394 : vector<8x64xf32>
    %396 = arith.mulf %387, %369 : vector<8x64xf32>
    %397 = arith.mulf %381, %389 : vector<8x64xf32>
    %398 = arith.addf %396, %397 : vector<8x64xf32>
    %399 = math.tanh %398 : vector<8x64xf32>
    %400 = arith.mulf %395, %399 : vector<8x64xf32>
    %401 = vector.extract_strided_slice %20 {offsets = [13, 0, 0], sizes = [1, 8, 256], strides = [1, 1, 1]} : vector<16x8x256xf32> to vector<1x8x256xf32>
    %402 = vector.shape_cast %401 : vector<1x8x256xf32> to vector<8x256xf32>
    %cst_68 = arith.constant dense<0.000000e+00> : vector<8x256xf32>
    %403 = tpu.matmul %400, %21, %cst_68 {dimension_numbers = #tpu.dot_dimension_numbers<[1], [0], [0], [1], [0, 0, 1, 1], [], []>} : vector<8x64xf32>, vector<64x256xf32>, vector<8x256xf32> -> vector<8x256xf32>
    %404 = arith.addf %402, %403 : vector<8x256xf32>
    %405 = vector.extract_strided_slice %404 {offsets = [0, 0], sizes = [8, 64], strides = [1, 1]} : vector<8x256xf32> to vector<8x64xf32>
    %406 = arith.negf %405 : vector<8x64xf32>
    %407 = math.exp %406 : vector<8x64xf32>
    %cst_69 = arith.constant 1.000000e+00 : f32
    %408 = vector.broadcast %cst_69 : f32 to vector<8x64xf32>
    %409 = arith.addf %408, %407 : vector<8x64xf32>
    %410 = arith.divf %408, %409 : vector<8x64xf32>
    %411 = vector.extract_strided_slice %404 {offsets = [0, 64], sizes = [8, 64], strides = [1, 1]} : vector<8x256xf32> to vector<8x64xf32>
    %412 = arith.negf %411 : vector<8x64xf32>
    %413 = math.exp %412 : vector<8x64xf32>
    %cst_70 = arith.constant 1.000000e+00 : f32
    %414 = vector.broadcast %cst_70 : f32 to vector<8x64xf32>
    %415 = arith.addf %414, %413 : vector<8x64xf32>
    %416 = arith.divf %414, %415 : vector<8x64xf32>
    %417 = vector.extract_strided_slice %404 {offsets = [0, 128], sizes = [8, 64], strides = [1, 1]} : vector<8x256xf32> to vector<8x64xf32>
    %418 = math.tanh %417 : vector<8x64xf32>
    %419 = vector.extract_strided_slice %404 {offsets = [0, 192], sizes = [8, 64], strides = [1, 1]} : vector<8x256xf32> to vector<8x64xf32>
    %420 = arith.negf %419 : vector<8x64xf32>
    %421 = math.exp %420 : vector<8x64xf32>
    %cst_71 = arith.constant 1.000000e+00 : f32
    %422 = vector.broadcast %cst_71 : f32 to vector<8x64xf32>
    %423 = arith.addf %422, %421 : vector<8x64xf32>
    %424 = arith.divf %422, %423 : vector<8x64xf32>
    %425 = arith.mulf %416, %398 : vector<8x64xf32>
    %426 = arith.mulf %410, %418 : vector<8x64xf32>
    %427 = arith.addf %425, %426 : vector<8x64xf32>
    %428 = math.tanh %427 : vector<8x64xf32>
    %429 = arith.mulf %424, %428 : vector<8x64xf32>
    %430 = vector.extract_strided_slice %20 {offsets = [14, 0, 0], sizes = [1, 8, 256], strides = [1, 1, 1]} : vector<16x8x256xf32> to vector<1x8x256xf32>
    %431 = vector.shape_cast %430 : vector<1x8x256xf32> to vector<8x256xf32>
    %cst_72 = arith.constant dense<0.000000e+00> : vector<8x256xf32>
    %432 = tpu.matmul %429, %21, %cst_72 {dimension_numbers = #tpu.dot_dimension_numbers<[1], [0], [0], [1], [0, 0, 1, 1], [], []>} : vector<8x64xf32>, vector<64x256xf32>, vector<8x256xf32> -> vector<8x256xf32>
    %433 = arith.addf %431, %432 : vector<8x256xf32>
    %434 = vector.extract_strided_slice %433 {offsets = [0, 0], sizes = [8, 64], strides = [1, 1]} : vector<8x256xf32> to vector<8x64xf32>
    %435 = arith.negf %434 : vector<8x64xf32>
    %436 = math.exp %435 : vector<8x64xf32>
    %cst_73 = arith.constant 1.000000e+00 : f32
    %437 = vector.broadcast %cst_73 : f32 to vector<8x64xf32>
    %438 = arith.addf %437, %436 : vector<8x64xf32>
    %439 = arith.divf %437, %438 : vector<8x64xf32>
    %440 = vector.extract_strided_slice %433 {offsets = [0, 64], sizes = [8, 64], strides = [1, 1]} : vector<8x256xf32> to vector<8x64xf32>
    %441 = arith.negf %440 : vector<8x64xf32>
    %442 = math.exp %441 : vector<8x64xf32>
    %cst_74 = arith.constant 1.000000e+00 : f32
    %443 = vector.broadcast %cst_74 : f32 to vector<8x64xf32>
    %444 = arith.addf %443, %442 : vector<8x64xf32>
    %445 = arith.divf %443, %444 : vector<8x64xf32>
    %446 = vector.extract_strided_slice %433 {offsets = [0, 128], sizes = [8, 64], strides = [1, 1]} : vector<8x256xf32> to vector<8x64xf32>
    %447 = math.tanh %446 : vector<8x64xf32>
    %448 = vector.extract_strided_slice %433 {offsets = [0, 192], sizes = [8, 64], strides = [1, 1]} : vector<8x256xf32> to vector<8x64xf32>
    %449 = arith.negf %448 : vector<8x64xf32>
    %450 = math.exp %449 : vector<8x64xf32>
    %cst_75 = arith.constant 1.000000e+00 : f32
    %451 = vector.broadcast %cst_75 : f32 to vector<8x64xf32>
    %452 = arith.addf %451, %450 : vector<8x64xf32>
    %453 = arith.divf %451, %452 : vector<8x64xf32>
    %454 = arith.mulf %445, %427 : vector<8x64xf32>
    %455 = arith.mulf %439, %447 : vector<8x64xf32>
    %456 = arith.addf %454, %455 : vector<8x64xf32>
    %457 = math.tanh %456 : vector<8x64xf32>
    %458 = arith.mulf %453, %457 : vector<8x64xf32>
    %459 = vector.extract_strided_slice %20 {offsets = [15, 0, 0], sizes = [1, 8, 256], strides = [1, 1, 1]} : vector<16x8x256xf32> to vector<1x8x256xf32>
    %460 = vector.shape_cast %459 : vector<1x8x256xf32> to vector<8x256xf32>
    %cst_76 = arith.constant dense<0.000000e+00> : vector<8x256xf32>
    %461 = tpu.matmul %458, %21, %cst_76 {dimension_numbers = #tpu.dot_dimension_numbers<[1], [0], [0], [1], [0, 0, 1, 1], [], []>} : vector<8x64xf32>, vector<64x256xf32>, vector<8x256xf32> -> vector<8x256xf32>
    %462 = arith.addf %460, %461 : vector<8x256xf32>
    %463 = vector.extract_strided_slice %462 {offsets = [0, 0], sizes = [8, 64], strides = [1, 1]} : vector<8x256xf32> to vector<8x64xf32>
    %464 = arith.negf %463 : vector<8x64xf32>
    %465 = math.exp %464 : vector<8x64xf32>
    %cst_77 = arith.constant 1.000000e+00 : f32
    %466 = vector.broadcast %cst_77 : f32 to vector<8x64xf32>
    %467 = arith.addf %466, %465 : vector<8x64xf32>
    %468 = arith.divf %466, %467 : vector<8x64xf32>
    %469 = vector.extract_strided_slice %462 {offsets = [0, 64], sizes = [8, 64], strides = [1, 1]} : vector<8x256xf32> to vector<8x64xf32>
    %470 = arith.negf %469 : vector<8x64xf32>
    %471 = math.exp %470 : vector<8x64xf32>
    %cst_78 = arith.constant 1.000000e+00 : f32
    %472 = vector.broadcast %cst_78 : f32 to vector<8x64xf32>
    %473 = arith.addf %472, %471 : vector<8x64xf32>
    %474 = arith.divf %472, %473 : vector<8x64xf32>
    %475 = vector.extract_strided_slice %462 {offsets = [0, 128], sizes = [8, 64], strides = [1, 1]} : vector<8x256xf32> to vector<8x64xf32>
    %476 = math.tanh %475 : vector<8x64xf32>
    %477 = vector.extract_strided_slice %462 {offsets = [0, 192], sizes = [8, 64], strides = [1, 1]} : vector<8x256xf32> to vector<8x64xf32>
    %478 = arith.negf %477 : vector<8x64xf32>
    %479 = math.exp %478 : vector<8x64xf32>
    %cst_79 = arith.constant 1.000000e+00 : f32
    %480 = vector.broadcast %cst_79 : f32 to vector<8x64xf32>
    %481 = arith.addf %480, %479 : vector<8x64xf32>
    %482 = arith.divf %480, %481 : vector<8x64xf32>
    %483 = arith.mulf %474, %456 : vector<8x64xf32>
    %484 = arith.mulf %468, %476 : vector<8x64xf32>
    %485 = arith.addf %483, %484 : vector<8x64xf32>
    %486 = math.tanh %485 : vector<8x64xf32>
    %487 = arith.mulf %482, %486 : vector<8x64xf32>
    %c0_80 = arith.constant 0 : index
    %c0_81 = arith.constant 0 : index
    %488 = vector.load %arg6[%c0_80, %c0_81] : memref<64x2xf32, #tpu.memory_space<vmem>>, vector<64x2xf32>
    %cst_82 = arith.constant dense<0.000000e+00> : vector<8x2xf32>
    %489 = tpu.matmul %487, %488, %cst_82 {dimension_numbers = #tpu.dot_dimension_numbers<[1], [0], [0], [1], [0, 0, 1, 1], [], []>} : vector<8x64xf32>, vector<64x2xf32>, vector<8x2xf32> -> vector<8x2xf32>
    %c0_83 = arith.constant 0 : index
    %c0_84 = arith.constant 0 : index
    %490 = vector.load %arg7[%c0_83, %c0_84] : memref<1x2xf32, #tpu.memory_space<vmem>>, vector<1x2xf32>
    %491 = vector.broadcast %490 : vector<1x2xf32> to vector<8x2xf32>
    %492 = arith.addf %489, %491 : vector<8x2xf32>
    %493 = vector.extract_strided_slice %492 {offsets = [0, 0], sizes = [2, 2], strides = [1, 1]} : vector<8x2xf32> to vector<2x2xf32>
    %c0_85 = arith.constant 0 : index
    %c0_86 = arith.constant 0 : index
    %494 = vector.load %arg8[%c0_85, %c0_86] : memref<2x2xf32, #tpu.memory_space<vmem>>, vector<2x2xf32>
    tpu.vector_store %arg8[%c0_85, %c0_86], %493 {strides = array<i32>} : memref<2x2xf32, #tpu.memory_space<vmem>>, vector<2x2xf32>,
    return
  }
}

</mosaic_0001>

<bundles_post_ra>
// kernel: conv1d_lstm_forward.1
= control target key start
LH: loop header
LB: loop body
LE: loop exit
PB: predicated region body
PF: predicated region fallthrough
CT: control target
= control target key end

     0   :  { %vm103_vm0 = vcmask 1042432   ;;  %vm54_vm1 = vcmask 23552   ;;  %s3823_s0 = inlined_call_operand.vmem [shape: f32[16,8,3], index: 0, kind: input, shape index: {}]   ;;  %s3824_s1 = inlined_call_operand.vmem [shape: f32[3,16], index: 1, kind: input, shape index: {}]   ;;  %s3825_s2 = inlined_call_operand.vmem [shape: f32[1,16], index: 2, kind: input, shape index: {}]   ;;  %s3826_s3 = inlined_call_operand.vmem [shape: f32[48,256], index: 3, kind: input, shape index: {}]   ;;  %s3827_s4 = inlined_call_operand.vmem [shape: f32[1,256], index: 4, kind: input, shape index: {}]   ;;  %s3828_s5 = inlined_call_operand.vmem [shape: f32[64,256], index: 5, kind: input, shape index: {}]   ;;  %s3829_s6 = inlined_call_operand.vmem [shape: f32[64,2], index: 6, kind: input, shape index: {}]   ;;  %s3830_s7 = inlined_call_operand.vmem [shape: f32[1,2], index: 7, kind: input, shape index: {}]   ;;  %s3831_s8 = inlined_call_operand.hbm [shape: f32[2,2], index: 8, kind: output, shape index: {}]  }
   0x1   :  { %v46_v0 = vld [vmem:[%s3824_s1] sm:$0x7]  ;;  %v31_v2 = vld [vmem:[%s3823_s0 + $0x8] sm:$0xff]  ;;  %v32_v3 = vld [vmem:[%s3823_s0 + $0x10] sm:$0xff] }
   0x2   :  { %v30_v1 = vld [vmem:[%s3823_s0] sm:$0xff]  ;;  %2462 = vmatprep.subr.msk.mxu0 %vm103_vm0, %v46_v0  ;;  %v33_v4 = vld [vmem:[%s3823_s0 + $0x18] sm:$0xff] }
   0x3   :  { %2464 = vmatprep.mubr.msk.f32.mxu0 %vm54_vm1, %v30_v1  ;;  %2463 = vmatpush3.msk.msra.mxu0 %vm103_vm0, %v46_v0  ;;  %v34_v5 = vld [vmem:[%s3823_s0 + $0x20] sm:$0xff] }
   0x4   :  { %2465 = vmatmul.mubr.msk.f32.vlgmr.msra.gmra.mrb[0].mxu0 %vm54_vm1, %v31_v2 }
   0x5   :  { %2467 = vmatprep.mubr.msk.f32.mxu0 %vm54_vm1, %v32_v3 }
   0x6   :  { %13 = vsyncpa [#allocation3], 0  ;;  %v35_v6 = vld [vmem:[%s3823_s0 + $0x28] sm:$0xff]  ;;  %v36_v7 = vld [vmem:[%s3823_s0 + $0x30] sm:$0xff]  ;;  %v3074_v24 = vmov 0.0   ;;  %s3075_s23 = smov 16  }
   0x7   :  { %v37_v8 = vld [vmem:[%s3823_s0 + $0x38] sm:$0xff]  ;;  %v38_v9 = vld [vmem:[%s3823_s0 + $0x40] sm:$0xff]  ;;  %v39_v10 = vld [vmem:[%s3823_s0 + $0x48] sm:$0xff]  ;;  %1216 = vmatprep.mubr.f32.mxu1 %v3074_v24  ;;  %vm365_vm2 = vcmask 130048   ;;  %vm382_vm3 = vcmask 261120   ;;  %vm423_vm4 = vcmask 392192  }
   0x8   :  { %2468 = vmatmul.mubr.msk.f32.gmra.mrb[2].mxu0 %vm54_vm1, %v33_v4  ;;  %v40_v11 = vld [vmem:[%s3823_s0 + $0x50] sm:$0xff]  ;;  %v41_v12 = vld [vmem:[%s3823_s0 + $0x58] sm:$0xff]  ;;  %v42_v13 = vld [vmem:[%s3823_s0 + $0x60] sm:$0xff]  ;;  %vm649_vm5 = vcmask 523264   ;;  %vm3079_vm6 = vmmov 0   ;;  %s3080_s17 = smov [#allocation2]  }
   0x9   :  { %2470 = vmatprep.mubr.msk.f32.mxu0 %vm54_vm1, %v34_v5  ;;  %v43_v14 = vld [vmem:[%s3823_s0 + $0x68] sm:$0xff]  ;;  %v44_v15 = vld [vmem:[%s3823_s0 + $0x70] sm:$0xff]  ;;  %v45_v16 = vld [vmem:[%s3823_s0 + $0x78] sm:$0xff]  ;;  %s2345_s18 = sshll.u32 %s3080_s17, 4  ;;  %vm2337_vm7 = vcmask 9216   ;;  %s2346_s18 = int_to_ptr.vmem [resolvable:$true] %s2345_s18 }
   0xa   :  { %v400_v17 = vld [vmem:[%s3826_s3 + $0x8] sm:$0xff]  ;;  %v402_v18 = vld [vmem:[%s3826_s3 + $0x18] sm:$0xff]  ;;  %v399_v19 = vld [vmem:[%s3826_s3] sm:$0xff]  ;;  %s3050_s19 = scalar_lea.vmem %s2346_s18, 32  ;;  %p3055_p1 = scmp.lt.s32.totalorder %s2346_s18, %s2346_s18 }
   0xb   :  { %v2507_v20 = vpack.c.bf16 %v402_v18, %v400_v17  ;;  %v401_v21 = vld [vmem:[%s3826_s3 + $0x10] sm:$0xff]  ;;  %v404_v22 = vld [vmem:[%s3826_s3 + $0x28] sm:$0xff]  ;;  %v406_v23 = vld [vmem:[%s3826_s3 + $0x38] sm:$0xff]  ;;  %p3051_p0 = scmp.ne.s32.totalorder %s2346_s18, %s3050_s19  ;;  %p3056_p2 = scmp.lt.s32.totalorder %s3050_s19, %s3050_s19 }
   0xc   :  { %2471 = vmatmul.mubr.msk.f32.gmra.mrb[4].mxu0 %vm54_vm1, %v35_v6  ;;  %v2509_v25 = vpack.c.bf16 %v401_v21, %v399_v19  ;;  %v2511_v26 = vpack.c.bf16 %v406_v23, %v404_v22  ;;  %v403_v27 = vld [vmem:[%s3826_s3 + $0x20] sm:$0xff]  ;;  %v405_v28 = vld [vmem:[%s3826_s3 + $0x30] sm:$0xff]  ;;  %v408_v29 = vld [vmem:[%s3826_s3 + $0x48] sm:$0xff] }
   0xd   :  { %2473 = vmatprep.mubr.msk.f32.mxu0 %vm54_vm1, %v36_v7  ;;  %2508 = vmatprep.subr.bf16.mxu0 %v2507_v20  ;;  %v410_v30 = vld [vmem:[%s3826_s3 + $0x58] sm:$0xff]  ;;  %v2513_v31 = vpack.c.bf16 %v405_v28, %v403_v27  ;;  %v407_v33 = vld [vmem:[%s3826_s3 + $0x40] sm:$0xff]  ;;  %v409_v34 = vld [vmem:[%s3826_s3 + $0x50] sm:$0xff]  ;;  %p3057_p3 = por %p3056_p2, %p3055_p1 }
   0xe   :  { %2510 = vmatpush1.bf16.msra.mxu0 %v2509_v25  ;;  %v2515_v32 = vpack.c.bf16 %v410_v30, %v408_v29  ;;  %v2517_v35 = vpack.c.bf16 %v409_v34, %v407_v33  ;;  %v634_v36 = vld [vmem:[%s3828_s5 + $0x8] sm:$0xff]  ;;  %v636_v37 = vld [vmem:[%s3828_s5 + $0x18] sm:$0xff]  ;;  %v633_v39 = vld [vmem:[%s3828_s5] sm:$0xff] }
   0xf   :  { %2512 = vmatprep.subr.bf16.mxu0 %v2511_v26  ;;  %v3237_v38 = vpack.c.bf16 %v636_v37, %v634_v36  ;;  %v635_v40 = vld [vmem:[%s3828_s5 + $0x10] sm:$0xff]  ;;  %v3250_v42 = vld [vmem:[%s3825_s2] ss:$0 sm:$0xff]  ;;  %s3076_s2 = smov 32   ;;  %v638_v53 = vld [vmem:[%s3828_s5 + $0x28] sm:$0xff]  ;;  %p3058_p4 = pnand %p3057_p3, %p3051_p0 }
  0x10   :  { %2474 = vmatmul.mubr.msk.f32.gmra.mrb[6].mxu0 %vm54_vm1, %v37_v8  ;;  %v3245_v41 = vpack.c.bf16 %v635_v40, %v633_v39  ;;  %v640_v54 = vld [vmem:[%s3828_s5 + $0x38] sm:$0xff]  ;;  %v637_v58 = vld [vmem:[%s3828_s5 + $0x20] sm:$0xff]  ;;  %v639_v59 = vld [vmem:[%s3828_s5 + $0x30] sm:$0xff] }
  0x11   :  { %2476 = vmatprep.mubr.msk.f32.mxu0 %vm54_vm1, %v38_v9  ;;  %2600 = vmatprep.subr.bf16.mxu1 %v3237_v38  ;;  %v3288_v57 = vpack.c.bf16 %v640_v54, %v638_v53  ;;  %v3296_v61 = vpack.c.bf16 %v639_v59, %v637_v58  ;;  %v642_v7 = vld [vmem:[%s3828_s5 + $0x48] sm:$0xff]  ;;  %v644_v8 = vld [vmem:[%s3828_s5 + $0x58] sm:$0xff]  ;;  %v645_v23 = vld [vmem:[%s3828_s5 + $0x60] sm:$0xff] }
  0x12   :  { %2514 = vmatpush1.bf16.msra.mxu0 %v2513_v31  ;;  %2602 = vmatpush1.bf16.msra.mxu1 %v3245_v41  ;;  %v646_v19 = vld [vmem:[%s3828_s5 + $0x68] sm:$0xff]  ;;  %v648_v20 = vld [vmem:[%s3828_s5 + $0x78] sm:$0xff]  ;;  %v647_v25 = vld [vmem:[%s3828_s5 + $0x70] sm:$0xff] }
  0x13   :  { %2516 = vmatprep.subr.bf16.mxu0 %v2515_v32  ;;  %2604 = vmatprep.subr.bf16.mxu1 %v3288_v57  ;;  %v3380_v22 = vpack.c.bf16 %v648_v20, %v646_v19  ;;  %v3388_v26 = vpack.c.bf16 %v647_v25, %v645_v23 }
  0x14   :  { %2477 = vmatmul.mubr.msk.f32.gmra.mrb[8].mxu0 %vm54_vm1, %v39_v10 }
  0x15   :  { %2479 = vmatprep.mubr.msk.f32.mxu0 %vm54_vm1, %v40_v11  ;;  %v3334_v11 = vpack.c.bf16 %v644_v8, %v642_v7 }
  0x16   :  { %2518 = vmatpush1.bf16.msra.mxu0 %v2517_v35  ;;  %2606 = vmatpush1.bf16.msra.mxu1 %v3296_v61 }
  0x17   :  { %2520 = vmatprep.subr.bf16.mxu0 %v3237_v38  ;;  %2608 = vmatprep.subr.bf16.mxu1 %v3334_v11 }
  0x18   :  { %2480 = vmatmul.mubr.msk.f32.gmra.mrb[10].mxu0 %vm54_vm1, %v41_v12  ;;  %v641_v12 = vld [vmem:[%s3828_s5 + $0x40] sm:$0xff] }
  0x19   :  { %2482 = vmatprep.mubr.msk.f32.mxu0 %vm54_vm1, %v42_v13  ;;  %v643_v13 = vld [vmem:[%s3828_s5 + $0x50] sm:$0xff] }
  0x1c   :  { %2483 = vmatmul.mubr.msk.f32.gmra.mrb[12].mxu0 %vm54_vm1, %v43_v14 }
  0x1d   :  { %2485 = vmatprep.mubr.msk.f32.mxu0 %vm54_vm1, %v44_v15  ;;  %v3342_v15 = vpack.c.bf16 %v643_v13, %v641_v12 }
  0x1f   :  { %2610 = vmatpush1.bf16.msra.mxu1 %v3342_v15 }
  0x20   :  { %2486 = vmatmul.mubr.msk.f32.gmra.mrb[14].mxu0 %vm54_vm1, %v45_v16  ;;  %2612 = vmatprep.subr.bf16.mxu1 %v3380_v22 }
  0x21   :  { %536 = vmatprep.mubr.f32.mxu0 %v3074_v24 }
  0x23   :  { %2614 = vmatpush1.bf16.msra.mxu1 %v3388_v26 }
  0x24   :  { %2616 = vmatprep.subr.bf16.mxu1 %v3237_v38 }
  0xd7   :  { %v2466_v43 = vpop.f32.mrb[0].mxu0 }
  0xd8   :  { %v3256_v44 = vadd.f32 %v2466_v43, %v3250_v42  ;;  %v173_v45 = vpop.f32.mrb[1].mxu0 }
  0xd9   :  { %v3259_v46 = vadd.f32 %v3250_v42, %v173_v45 }
  0xda   :  { %270 = vrot.lane.b32.xlu1 %v3256_v44, %s3075_s23 }
  0xdb   :  { %v2469_v47 = vpop.f32.mrb[2].mxu0  ;;  %268 = vrot.lane.b32.xlu0 %v3259_v46, %s3075_s23 }
  0xdc   :  { %v183_v48 = vpop.f32.mrb[3].mxu0  ;;  %v3269_v50 = vadd.f32 %v2469_v47, %v3250_v42 }
  0xdd   :  { %v3266_v49 = vadd.f32 %v3250_v42, %v183_v48 }
  0xdf   :  { %319 = vrot.lane.b32.xlu1 %v3266_v49, %s3076_s2  ;;  %317 = vrot.lane.b32.xlu0 %v3256_v44, %s3076_s2  ;;  %v2472_v51 = vpop.f32.mrb[4].mxu0 }
  0xe0   :  { %v193_v52 = vpop.f32.mrb[5].mxu0  ;;  %v3301_v62 = vadd.f32 %v2472_v51, %v3250_v42 }
  0xe1   :  { %v3286_v55 = vadd.f32 %v3250_v42, %v193_v52 }
  0xe3   :  { %321 = vrot.lane.b32.xlu1 %v3269_v50, %s3076_s2  ;;  %272 = vrot.lane.b32.xlu0 %v3266_v49, %s3075_s23  ;;  %v2475_v56 = vpop.f32.mrb[6].mxu0 }
  0xe4   :  { %v203_v60 = vpop.f32.mrb[7].mxu0  ;;  %v3315_v4 = vadd.f32 %v2475_v56, %v3250_v42 }
  0xe5   :  { %v3312_v1 = vadd.f32 %v3250_v42, %v203_v60 }
  0xe7   :  { %323 = vrot.lane.b32.xlu1 %v3286_v55, %s3076_s2  ;;  %274 = vrot.lane.b32.xlu0 %v3269_v50, %s3075_s23  ;;  %v2478_v63 = vpop.f32.mrb[8].mxu0 }
  0xe8   :  { %v213_v0 = vpop.f32.mrb[9].mxu0  ;;  %v3347_v16 = vadd.f32 %v2478_v63, %v3250_v42 }
  0xe9   :  { %v3332_v9 = vadd.f32 %v3250_v42, %v213_v0 }
  0xeb   :  { %325 = vrot.lane.b32.xlu1 %v3301_v62, %s3076_s2  ;;  %276 = vrot.lane.b32.xlu0 %v3286_v55, %s3075_s23  ;;  %v2481_v2 = vpop.f32.mrb[10].mxu0 }
  0xec   :  { %v223_v3 = vpop.f32.mrb[11].mxu0  ;;  %v3361_v18 = vadd.f32 %v2481_v2, %v3250_v42 }
  0xed   :  { %v3358_v17 = vadd.f32 %v3250_v42, %v223_v3 }
  0xef   :  { %327 = vrot.lane.b32.xlu1 %v3312_v1, %s3076_s2  ;;  %278 = vrot.lane.b32.xlu0 %v3301_v62, %s3075_s23  ;;  %v2484_v5 = vpop.f32.mrb[12].mxu0 }
  0xf0   :  { %v233_v6 = vpop.f32.mrb[13].mxu0  ;;  %v3393_v27 = vadd.f32 %v2484_v5, %v3250_v42 }
  0xf1   :  { %v3378_v21 = vadd.f32 %v3250_v42, %v233_v6 }
  0xf3   :  { %329 = vrot.lane.b32.xlu1 %v3315_v4, %s3076_s2  ;;  %280 = vrot.lane.b32.xlu0 %v3312_v1, %s3075_s23  ;;  %v2487_v10 = vpop.f32.mrb[14].mxu0 }
  0xf4   :  { %v243_v14 = vpop.f32.mrb[15].mxu0  ;;  %v249_v29 = vadd.f32 %v2487_v10, %v3250_v42 }
  0xf5   :  { %v3405_v28 = vadd.f32 %v3250_v42, %v243_v14 }
  0xf7   :  { %331 = vrot.lane.b32.xlu1 %v3332_v9, %s3076_s2  ;;  %282 = vrot.lane.b32.xlu0 %v3315_v4, %s3075_s23 }
  0xfb   :  { %333 = vrot.lane.b32.xlu1 %v3347_v16, %s3076_s2  ;;  %284 = vrot.lane.b32.xlu0 %v3332_v9, %s3075_s23 }
  0xff   :  { %335 = vrot.lane.b32.xlu1 %v3358_v17, %s3076_s2  ;;  %286 = vrot.lane.b32.xlu0 %v3347_v16, %s3075_s23 }
 0x103   :  { %337 = vrot.lane.b32.xlu1 %v3361_v18, %s3076_s2  ;;  %288 = vrot.lane.b32.xlu0 %v3358_v17, %s3075_s23 }
 0x107   :  { %339 = vrot.lane.b32.xlu1 %v3378_v21, %s3076_s2  ;;  %290 = vrot.lane.b32.xlu0 %v3361_v18, %s3075_s23 }
 0x10b   :  { %341 = vrot.lane.b32.xlu1 %v3393_v27, %s3076_s2  ;;  %292 = vrot.lane.b32.xlu0 %v3378_v21, %s3075_s23 }
 0x10f   :  { %343 = vrot.lane.b32.xlu1 %v3405_v28, %s3076_s2  ;;  %294 = vrot.lane.b32.xlu0 %v3393_v27, %s3075_s23 }
 0x113   :  { %345 = vrot.lane.b32.xlu1 %v249_v29, %s3076_s2  ;;  %296 = vrot.lane.b32.xlu0 %v3405_v28, %s3075_s23 }
 0x117   :  { %298 = vrot.lane.b32.xlu0 %v249_v29, %s3075_s23  ;;  %347 = vrot.lane.b32.xlu1 %v3074_v24, %s3076_s2 }
 0x14c   :  { %v271_v30 = vpop.permute.xlu1 %270 }
 0x14d   :  { %v269_v31 = vpop.permute.xlu0 %268  ;;  %v367_v36 = vsel %vm365_vm2, %v3259_v46, %v271_v30 }
 0x14e   :  { %v366_v32 = vsel %vm365_vm2, 0.0, %v269_v31 }
 0x151   :  { %v320_v33 = vpop.permute.xlu1 %319  ;;  %v318_v34 = vpop.permute.xlu0 %317 }
 0x152   :  { %v383_v35 = vsel %vm382_vm3, %v366_v32, %v318_v34  ;;  %v384_v40 = vsel %vm382_vm3, %v367_v36, %v320_v33 }
 0x153   :  { %2371 = vmatmul.mubr.msk.f32.vlgmr.msra.gmra.mrb[16].mxu0 %vm423_vm4, %v383_v35 }
 0x154   :  { %2522 = vmatpush1.bf16.msra.mxu0 %v3245_v41  ;;  %542 = vmatprep.mubr.f32.mxu0 %v3074_v24 }
 0x155   :  { %v322_v37 = vpop.permute.xlu1 %321  ;;  %v273_v39 = vpop.permute.xlu0 %272  ;;  %2524 = vmatprep.subr.bf16.mxu0 %v3288_v57 }
 0x156   :  { %v368_v42 = vsel %vm365_vm2, %v3256_v44, %v273_v39 }
 0x157   :  { %2372 = vmatmul.mubr.msk.f32.gmra.mrb[18].mxu0 %vm423_vm4, %v384_v40  ;;  %v385_v46 = vsel %vm382_vm3, %v368_v42, %v322_v37 }
 0x158   :  { %548 = vmatprep.mubr.f32.mxu0 %v3074_v24  ;;  %2526 = vmatpush1.bf16.msra.mxu0 %v3296_v61 }
 0x159   :  { %v324_v43 = vpop.permute.xlu1 %323  ;;  %v275_v45 = vpop.permute.xlu0 %274  ;;  %2528 = vmatprep.subr.bf16.mxu0 %v3334_v11 }
 0x15a   :  { %v369_v47 = vsel %vm365_vm2, %v3266_v49, %v275_v45 }
 0x15b   :  { %2373 = vmatmul.mubr.msk.f32.gmra.mrb[20].mxu0 %vm423_vm4, %v385_v46  ;;  %v386_v51 = vsel %vm382_vm3, %v369_v47, %v324_v43 }
 0x15c   :  { %554 = vmatprep.mubr.f32.mxu0 %v3074_v24  ;;  %2530 = vmatpush1.bf16.msra.mxu0 %v3342_v15 }
 0x15d   :  { %v326_v44 = vpop.permute.xlu1 %325  ;;  %v277_v48 = vpop.permute.xlu0 %276  ;;  %2532 = vmatprep.subr.bf16.mxu0 %v3380_v22 }
 0x15e   :  { %v370_v52 = vsel %vm365_vm2, %v3269_v50, %v277_v48 }
 0x15f   :  { %2374 = vmatmul.mubr.msk.f32.gmra.mrb[22].mxu0 %vm423_vm4, %v386_v51  ;;  %v387_v54 = vsel %vm382_vm3, %v370_v52, %v326_v44 }
 0x160   :  { %560 = vmatprep.mubr.f32.mxu0 %v3074_v24  ;;  %2534 = vmatpush1.bf16.msra.mxu0 %v3388_v26 }
 0x161   :  { %v328_v49 = vpop.permute.xlu1 %327  ;;  %v279_v53 = vpop.permute.xlu0 %278  ;;  %2536 = vmatprep.subr.bf16.mxu0 %v3237_v38 }
 0x162   :  { %v371_v56 = vsel %vm365_vm2, %v3286_v55, %v279_v53 }
 0x163   :  { %2375 = vmatmul.mubr.msk.f32.gmra.mrb[24].mxu0 %vm423_vm4, %v387_v54  ;;  %v388_v59 = vsel %vm382_vm3, %v371_v56, %v328_v49 }
 0x164   :  { %566 = vmatprep.mubr.f32.mxu0 %v3074_v24 }
 0x165   :  { %v330_v50 = vpop.permute.xlu1 %329  ;;  %v281_v58 = vpop.permute.xlu0 %280 }
 0x166   :  { %v372_v60 = vsel %vm365_vm2, %v3301_v62, %v281_v58 }
 0x167   :  { %2376 = vmatmul.mubr.msk.f32.gmra.mrb[26].mxu0 %vm423_vm4, %v388_v59  ;;  %v389_v2 = vsel %vm382_vm3, %v372_v60, %v330_v50  ;;  %v413_v59 = vlaneseq }
 0x168   :  { %572 = vmatprep.mubr.f32.mxu0 %v3074_v24 }
 0x169   :  { %v332_v63 = vpop.permute.xlu1 %331  ;;  %v283_v0 = vpop.permute.xlu0 %282 }
 0x16a   :  { %v373_v55 = vsel %vm365_vm2, %v3312_v1, %v283_v0  ;;  %v414_v0 = vshrl.u32 %v413_v59, 7 }
 0x16b   :  { %2377 = vmatmul.mubr.msk.f32.gmra.mrb[28].mxu0 %vm423_vm4, %v389_v2  ;;  %v390_v6 = vsel %vm382_vm3, %v373_v55, %v332_v63 }
 0x16c   :  { %578 = vmatprep.mubr.f32.mxu0 %v3074_v24 }
 0x16d   :  { %v334_v3 = vpop.permute.xlu1 %333  ;;  %v285_v5 = vpop.permute.xlu0 %284 }
 0x16e   :  { %v374_v62 = vsel %vm365_vm2, %v3315_v4, %v285_v5  ;;  %v411_v5 = vld [vmem:[%s3827_s4] sm:$0x3]  ;;  %s3077_s4 = smov 64  }
 0x16f   :  { %2378 = vmatmul.mubr.msk.f32.gmra.mrb[30].mxu0 %vm423_vm4, %v390_v6  ;;  %v391_v10 = vsel %vm382_vm3, %v374_v62, %v334_v3  ;;  %v415_v3 = vsub.s32 0, %v414_v0 }
 0x170   :  { %584 = vmatprep.mubr.f32.mxu0 %v3074_v24 }
 0x171   :  { %v336_v7 = vpop.permute.xlu1 %335  ;;  %v287_v8 = vpop.permute.xlu0 %286 }
 0x172   :  { %v375_v1 = vsel %vm365_vm2, %v3332_v9, %v287_v8 }
 0x173   :  { %2379 = vmatmul.mubr.msk.f32.gmra.mrb[32].mxu0 %vm423_vm4, %v391_v10  ;;  %v392_v14 = vsel %vm382_vm3, %v375_v1, %v336_v7  ;;  %v3562_v7 = vrot.slane %v411_v5, %v415_v3 }
 0x174   :  { %590 = vmatprep.mubr.f32.mxu0 %v3074_v24 }
 0x175   :  { %v338_v12 = vpop.permute.xlu1 %337  ;;  %v289_v13 = vpop.permute.xlu0 %288 }
 0x176   :  { %v376_v4 = vsel %vm365_vm2, %v3347_v16, %v289_v13  ;;  %v419_v13 = vsub.s32 1, %v414_v0 }
 0x177   :  { %2380 = vmatmul.mubr.msk.f32.gmra.mrb[34].mxu0 %vm423_vm4, %v392_v14  ;;  %v393_v23 = vsel %vm382_vm3, %v376_v4, %v338_v12 }
 0x178   :  { %596 = vmatprep.mubr.f32.mxu0 %v3074_v24  ;;  %v3565_v14 = vrot.slane %v411_v5, %v419_v13 }
 0x179   :  { %v340_v19 = vpop.permute.xlu1 %339  ;;  %v291_v20 = vpop.permute.xlu0 %290 }
 0x17a   :  { %v377_v9 = vsel %vm365_vm2, %v3358_v17, %v291_v20 }
 0x17b   :  { %2381 = vmatmul.mubr.msk.f32.gmra.mrb[36].mxu0 %vm423_vm4, %v393_v23  ;;  %v394_v30 = vsel %vm382_vm3, %v377_v9, %v340_v19 }
 0x17c   :  { %602 = vmatprep.mubr.f32.mxu0 %v3074_v24 }
 0x17d   :  { %v342_v25 = vpop.permute.xlu1 %341  ;;  %v293_v29 = vpop.permute.xlu0 %292 }
 0x17e   :  { %v378_v16 = vsel %vm365_vm2, %v3361_v18, %v293_v29 }
 0x17f   :  { %2382 = vmatmul.mubr.msk.f32.gmra.mrb[38].mxu0 %vm423_vm4, %v394_v30  ;;  %v395_v33 = vsel %vm382_vm3, %v378_v16, %v342_v25 }
 0x180   :  { %608 = vmatprep.mubr.f32.mxu0 %v3074_v24 }
 0x181   :  { %v344_v31 = vpop.permute.xlu1 %343  ;;  %v295_v32 = vpop.permute.xlu0 %294 }
 0x182   :  { %v379_v17 = vsel %vm365_vm2, %v3378_v21, %v295_v32 }
 0x183   :  { %2383 = vmatmul.mubr.msk.f32.gmra.mrb[40].mxu0 %vm423_vm4, %v395_v33  ;;  %v396_v36 = vsel %vm382_vm3, %v379_v17, %v344_v31 }
 0x184   :  { %614 = vmatprep.mubr.f32.mxu0 %v3074_v24 }
 0x185   :  { %v346_v34 = vpop.permute.xlu1 %345  ;;  %v297_v35 = vpop.permute.xlu0 %296 }
 0x186   :  { %v380_v18 = vsel %vm365_vm2, %v3393_v27, %v297_v35 }
 0x187   :  { %2384 = vmatmul.mubr.msk.f32.gmra.mrb[42].mxu0 %vm423_vm4, %v396_v36  ;;  %v397_v39 = vsel %vm382_vm3, %v380_v18, %v346_v34 }
 0x188   :  { %620 = vmatprep.mubr.f32.mxu0 %v3074_v24 }
 0x189   :  { %v299_v37 = vpop.permute.xlu0 %298  ;;  %v348_v40 = vpop.permute.xlu1 %347 }
 0x18a   :  { %v381_v21 = vsel %vm365_vm2, %v3405_v28, %v299_v37 }
 0x18b   :  { %2385 = vmatmul.mubr.msk.f32.gmra.mrb[44].mxu0 %vm423_vm4, %v397_v39  ;;  %v398_v42 = vsel %vm382_vm3, %v381_v21, %v348_v40 }
 0x18c   :  { %626 = vmatprep.mubr.f32.mxu0 %v3074_v24 }
 0x18f   :  { %2386 = vmatmul.mubr.msk.f32.gmra.mrb[46].mxu0 %vm423_vm4, %v398_v42 }
 0x190   :  { %716 = vmatprep.mubr.f32.mxu0 %v3074_v24 }
 0x193   :  { %717 = vmatmul.mubr.f32.vlgmr.msra.gmra.mrb[16].mxu0 %v3074_v24 }
 0x194   :  { %2538 = vmatpush1.bf16.msra.mxu0 %v3245_v41  ;;  %816 = vmatprep.mubr.f32.mxu0 %v3074_v24 }
 0x195   :  { %2540 = vmatprep.subr.bf16.mxu0 %v3288_v57 }
 0x198   :  { %2542 = vmatpush1.bf16.msra.mxu0 %v3296_v61 }
 0x199   :  { %2544 = vmatprep.subr.bf16.mxu0 %v3334_v11 }
 0x19c   :  { %2546 = vmatpush1.bf16.msra.mxu0 %v3342_v15 }
 0x19d   :  { %2548 = vmatprep.subr.bf16.mxu0 %v3380_v22 }
 0x1a0   :  { %2550 = vmatpush1.bf16.msra.mxu0 %v3388_v26 }
 0x1a1   :  { %2552 = vmatprep.subr.bf16.mxu0 %v3237_v38 }
 0x23a   :  { %v3515_v27 = vpop.f32.mrb[26].mxu0 }
 0x23b   :  { %v3517_v28 = vpop.f32.mrb[27].mxu0 }
 0x23e   :  { %v3519_v43 = vpop.f32.mrb[28].mxu0 }
 0x23f   :  { %v3521_v45 = vpop.f32.mrb[29].mxu0 }
 0x242   :  { %v3523_v46 = vpop.f32.mrb[30].mxu0 }
 0x243   :  { %v3525_v47 = vpop.f32.mrb[31].mxu0 }
 0x246   :  { %v3527_v44 = vpop.f32.mrb[32].mxu0 }
 0x247   :  { %v3529_v48 = vpop.f32.mrb[33].mxu0 }
 0x24a   :  { %v3531_v51 = vpop.f32.mrb[34].mxu0 }
 0x24b   :  { %v3533_v52 = vpop.f32.mrb[35].mxu0 }
 0x24e   :  { %v3535_v49 = vpop.f32.mrb[36].mxu0 }
 0x24f   :  { %v3537_v53 = vpop.f32.mrb[37].mxu0 }
 0x252   :  { %v3539_v54 = vpop.f32.mrb[38].mxu0 }
 0x253   :  { %v3541_v56 = vpop.f32.mrb[39].mxu0 }
 0x256   :  { %v3543_v50 = vpop.f32.mrb[40].mxu0 }
 0x257   :  { %v3545_v58 = vpop.f32.mrb[41].mxu0 }
 0x25a   :  { %v3547_v60 = vpop.f32.mrb[42].mxu0 }
 0x25b   :  { %v3549_v63 = vpop.f32.mrb[43].mxu0 }
 0x25e   :  { %v3551_v2 = vpop.f32.mrb[44].mxu0 }
 0x25f   :  { %v3553_v55 = vpop.f32.mrb[45].mxu0 }
 0x262   :  { %v3558_v6 = vpop.f32.mrb[46].mxu0 }
 0x263   :  { %v3560_v62 = vpop.f32.mrb[47].mxu0 }
 0x266   :  { %v718_v8 = vpop.f32.mrb[16].mxu0 }
 0x267   :  { %v2787_v10 = vadd.f32 %v718_v8, %v3562_v7  ;;  %v720_v1 = vpop.f32.mrb[17].mxu0 }
 0x268   :  { %v2788_v4 = vadd.f32 %v720_v1, %v3565_v14 }
 0x269   :  { %v2387_v12 = vmul.f32 -1.442695, %v2787_v10 }
 0x26a   :  { %v2388_v29 = vmul.f32 -1.442695, %v2788_v4 }
 0x26b   :  { %2858 = vpow2.f32 %v2387_v12 }
 0x26c   :  { %2860 = vtanh.f32 %v2788_v4 }
 0x275   :  { %v2859_v19 = vpop.eup %2858 }
 0x276   :  { %v728_v20 = vadd.f32 1.0, %v2859_v19  ;;  %v2861_v23 = vpop.eup %2860 }
 0x278   :  { %2862 = vrcp.f32 %v728_v20 }
 0x279   :  { %2864 = vpow2.f32 %v2388_v29 }
 0x282   :  { %v2863_v9 = vpop.eup %2862 }
 0x283   :  { %v739_v25 = vmul.f32 %v2863_v9, %v2861_v23  ;;  %v2865_v30 = vpop.eup %2864  ;;  %v738_v31 = vmul.f32 0.0, %v2863_v9 }
 0x284   :  { %v735_v16 = vadd.f32 1.0, %v2865_v30 }
 0x285   :  { %741 = vrot.lane.b32.xlu0 %v739_v25, %s3077_s4 }
 0x286   :  { %2866 = vrcp.f32 %v735_v16 }
 0x290   :  { %v2867_v17 = vpop.eup %2866 }
 0x2f7   :  { %v742_v32 = vpop.permute.xlu0 %741 }
 0x2f8   :  { %v744_v33 = vadd.f32 %v742_v32, %v738_v31 }
 0x2fa   :  { %2868 = vtanh.f32 %v744_v33 }
 0x304   :  { %v2869_v34 = vpop.eup %2868 }
 0x305   :  { %v746_v35 = vmul.f32 %v2869_v34, %v2867_v17 }
 0x307   :  { %748 = vrot.lane.b32.xlu1 %v746_v35, %s3077_s4 }
 0x379   :  { %v749_v36 = vpop.permute.xlu1 %748 }
 0x37a   :  { %2389 = vmatmul.mubr.msk.f32.vlgmr.msra.gmra.mrb[18].mxu0 %vm649_vm5, %v749_v36 }
 0x37b   :  { %2554 = vmatpush1.bf16.msra.mxu0 %v3245_v41  ;;  %916 = vmatprep.mubr.f32.mxu0 %v3074_v24 }
 0x37c   :  { %2556 = vmatprep.subr.bf16.mxu0 %v3288_v57 }
 0x37f   :  { %2558 = vmatpush1.bf16.msra.mxu0 %v3296_v61 }
 0x380   :  { %2560 = vmatprep.subr.bf16.mxu0 %v3334_v11 }
 0x383   :  { %2562 = vmatpush1.bf16.msra.mxu0 %v3342_v15 }
 0x384   :  { %2564 = vmatprep.subr.bf16.mxu0 %v3380_v22 }
 0x387   :  { %2566 = vmatpush1.bf16.msra.mxu0 %v3388_v26 }
 0x388   :  { %2568 = vmatprep.subr.bf16.mxu0 %v3237_v38 }
 0x44d   :  { %v818_v18 = vpop.f32.mrb[18].mxu0 }
 0x44e   :  { %v2789_v37 = vadd.f32 %v818_v18, %v3562_v7  ;;  %v820_v39 = vpop.f32.mrb[19].mxu0 }
 0x44f   :  { %v2790_v40 = vadd.f32 %v820_v39, %v3565_v14 }
 0x450   :  { %v2390_v21 = vmul.f32 -1.442695, %v2789_v37 }
 0x451   :  { %v2391_v8 = vmul.f32 -1.442695, %v2790_v40 }
 0x452   :  { %2870 = vpow2.f32 %v2390_v21 }
 0x453   :  { %2872 = vtanh.f32 %v2790_v40 }
 0x45c   :  { %v2871_v42 = vpop.eup %2870 }
 0x45d   :  { %v828_v59 = vadd.f32 1.0, %v2871_v42  ;;  %v2873_v0 = vpop.eup %2872 }
 0x45f   :  { %2874 = vrcp.f32 %v828_v59 }
 0x460   :  { %2876 = vpow2.f32 %v2391_v8 }
 0x469   :  { %v2875_v3 = vpop.eup %2874 }
 0x46a   :  { %v839_v5 = vmul.f32 %v2875_v3, %v2873_v0  ;;  %v2877_v10 = vpop.eup %2876  ;;  %v838_v12 = vmul.f32 %v2875_v3, %v744_v33 }
 0x46b   :  { %v835_v1 = vadd.f32 1.0, %v2877_v10 }
 0x46c   :  { %841 = vrot.lane.b32.xlu0 %v839_v5, %s3077_s4 }
 0x46d   :  { %2878 = vrcp.f32 %v835_v1 }
 0x477   :  { %v2879_v19 = vpop.eup %2878 }
 0x4de   :  { %v842_v13 = vpop.permute.xlu0 %841 }
 0x4df   :  { %v844_v4 = vadd.f32 %v842_v13, %v838_v12 }
 0x4e1   :  { %2880 = vtanh.f32 %v844_v4 }
 0x4eb   :  { %v2881_v20 = vpop.eup %2880 }
 0x4ec   :  { %v846_v23 = vmul.f32 %v2881_v20, %v2879_v19 }
 0x4ee   :  { %848 = vrot.lane.b32.xlu1 %v846_v23, %s3077_s4 }
 0x560   :  { %v849_v9 = vpop.permute.xlu1 %848 }
 0x561   :  { %2392 = vmatmul.mubr.msk.f32.vlgmr.msra.gmra.mrb[20].mxu0 %vm649_vm5, %v849_v9 }
 0x562   :  { %2570 = vmatpush1.bf16.msra.mxu0 %v3245_v41  ;;  %1016 = vmatprep.mubr.f32.mxu0 %v3074_v24 }
 0x563   :  { %2572 = vmatprep.subr.bf16.mxu0 %v3288_v57 }
 0x566   :  { %2574 = vmatpush1.bf16.msra.mxu0 %v3296_v61 }
 0x567   :  { %2576 = vmatprep.subr.bf16.mxu0 %v3334_v11 }
 0x56a   :  { %2578 = vmatpush1.bf16.msra.mxu0 %v3342_v15 }
 0x56b   :  { %2580 = vmatprep.subr.bf16.mxu0 %v3380_v22 }
 0x56e   :  { %2582 = vmatpush1.bf16.msra.mxu0 %v3388_v26 }
 0x56f   :  { %2584 = vmatprep.subr.bf16.mxu0 %v3237_v38 }
 0x634   :  { %v918_v25 = vpop.f32.mrb[20].mxu0 }
 0x635   :  { %v2791_v29 = vadd.f32 %v918_v25, %v3562_v7  ;;  %v920_v30 = vpop.f32.mrb[21].mxu0 }
 0x636   :  { %v2792_v31 = vadd.f32 %v920_v30, %v3565_v14 }
 0x637   :  { %v2393_v16 = vmul.f32 -1.442695, %v2791_v29 }
 0x638   :  { %v2394_v36 = vmul.f32 -1.442695, %v2792_v31 }
 0x639   :  { %2882 = vpow2.f32 %v2393_v16 }
 0x63a   :  { %2884 = vtanh.f32 %v2792_v31 }
 0x643   :  { %v2883_v32 = vpop.eup %2882 }
 0x644   :  { %v928_v33 = vadd.f32 1.0, %v2883_v32  ;;  %v2885_v17 = vpop.eup %2884 }
 0x646   :  { %2886 = vrcp.f32 %v928_v33 }
 0x647   :  { %2888 = vpow2.f32 %v2394_v36 }
 0x650   :  { %v2887_v34 = vpop.eup %2886 }
 0x651   :  { %v939_v35 = vmul.f32 %v2887_v34, %v2885_v17  ;;  %v2889_v18 = vpop.eup %2888  ;;  %v938_v39 = vmul.f32 %v2887_v34, %v844_v4 }
 0x652   :  { %v935_v37 = vadd.f32 1.0, %v2889_v18 }
 0x653   :  { %941 = vrot.lane.b32.xlu0 %v939_v35, %s3077_s4 }
 0x654   :  { %2890 = vrcp.f32 %v935_v37 }
 0x65e   :  { %v2891_v42 = vpop.eup %2890 }
 0x6c5   :  { %v942_v21 = vpop.permute.xlu0 %941 }
 0x6c6   :  { %v944_v40 = vadd.f32 %v942_v21, %v938_v39 }
 0x6c8   :  { %2892 = vtanh.f32 %v944_v40 }
 0x6d2   :  { %v2893_v59 = vpop.eup %2892 }
 0x6d3   :  { %v946_v0 = vmul.f32 %v2893_v59, %v2891_v42 }
 0x6d5   :  { %948 = vrot.lane.b32.xlu1 %v946_v0, %s3077_s4 }
 0x747   :  { %v949_v3 = vpop.permute.xlu1 %948 }
 0x748   :  { %2395 = vmatmul.mubr.msk.f32.vlgmr.msra.gmra.mrb[22].mxu0 %vm649_vm5, %v949_v3 }
 0x749   :  { %2586 = vmatpush1.bf16.msra.mxu0 %v3245_v41  ;;  %1116 = vmatprep.mubr.f32.mxu0 %v3074_v24 }
 0x74a   :  { %2588 = vmatprep.subr.bf16.mxu0 %v3288_v57 }
 0x74d   :  { %2590 = vmatpush1.bf16.msra.mxu0 %v3296_v61 }
 0x74e   :  { %2592 = vmatprep.subr.bf16.mxu0 %v3334_v11 }
 0x751   :  { %2594 = vmatpush1.bf16.msra.mxu0 %v3342_v15 }
 0x752   :  { %2596 = vmatprep.subr.bf16.mxu0 %v3380_v22 }
 0x755   :  { %2598 = vmatpush1.bf16.msra.mxu0 %v3388_v26 }
 0x81b   :  { %v1018_v5 = vpop.f32.mrb[22].mxu0 }
 0x81c   :  { %v2793_v8 = vadd.f32 %v1018_v5, %v3562_v7  ;;  %v1020_v10 = vpop.f32.mrb[23].mxu0 }
 0x81d   :  { %v2794_v12 = vadd.f32 %v1020_v10, %v3565_v14 }
 0x81e   :  { %v2396_v1 = vmul.f32 -1.442695, %v2793_v8 }
 0x81f   :  { %v2397_v9 = vmul.f32 -1.442695, %v2794_v12 }
 0x820   :  { %2894 = vpow2.f32 %v2396_v1 }
 0x821   :  { %2896 = vtanh.f32 %v2794_v12 }
 0x82a   :  { %v2895_v13 = vpop.eup %2894 }
 0x82b   :  { %v1028_v4 = vadd.f32 1.0, %v2895_v13  ;;  %v2897_v19 = vpop.eup %2896 }
 0x82d   :  { %2898 = vrcp.f32 %v1028_v4 }
 0x82e   :  { %2900 = vpow2.f32 %v2397_v9  ;;  %v571_v9 = vadd.f32 %v3517_v28, %v3565_v14 }
 0x837   :  { %v2899_v20 = vpop.eup %2898 }
 0x838   :  { %v1039_v23 = vmul.f32 %v2899_v20, %v2897_v19  ;;  %v2901_v25 = vpop.eup %2900  ;;  %v1038_v30 = vmul.f32 %v2899_v20, %v944_v40 }
 0x839   :  { %v1035_v29 = vadd.f32 1.0, %v2901_v25 }
 0x83a   :  { %1041 = vrot.lane.b32.xlu0 %v1039_v23, %s3077_s4  ;;  %v569_v23 = vadd.f32 %v3515_v27, %v3562_v7 }
 0x83b   :  { %2902 = vrcp.f32 %v1035_v29 }
 0x845   :  { %v2903_v32 = vpop.eup %2902 }
 0x8ac   :  { %v1042_v16 = vpop.permute.xlu0 %1041 }
 0x8ad   :  { %v1044_v31 = vadd.f32 %v1042_v16, %v1038_v30 }
 0x8af   :  { %2904 = vtanh.f32 %v1044_v31 }
 0x8b9   :  { %v2905_v33 = vpop.eup %2904 }
 0x8ba   :  { %v1046_v17 = vmul.f32 %v2905_v33, %v2903_v32 }
 0x8bc   :  { %1048 = vrot.lane.b32.xlu1 %v1046_v17, %s3077_s4 }
 0x92e   :  { %v1049_v34 = vpop.permute.xlu1 %1048 }
 0x92f   :  { %2398 = vmatmul.mubr.msk.f32.vlgmr.msra.gmra.mrb[24].mxu0 %vm649_vm5, %v1049_v34 }
 0x930   :  { %2504 = vmatprep.mubr.msk.f32.mxu0 %vm3079_vm6, %v3074_v24 }
 0xa02   :  { %v1118_v35 = vpop.f32.mrb[24].mxu0 }
 0xa03   :  { %v2795_v36 = vadd.f32 %v1118_v35, %v3562_v7  ;;  %v1120_v18 = vpop.f32.mrb[25].mxu0 }
 0xa04   :  { %v2796_v39 = vadd.f32 %v1120_v18, %v3565_v14 }
 0xa05   :  { %v2399_v37 = vmul.f32 -1.442695, %v2795_v36 }
 0xa06   :  { %v2400_v3 = vmul.f32 -1.442695, %v2796_v39 }
 0xa07   :  { %2906 = vpow2.f32 %v2399_v37 }
 0xa08   :  { %2908 = vtanh.f32 %v2796_v39 }
 0xa11   :  { %v2907_v21 = vpop.eup %2906 }
 0xa12   :  { %v1128_v40 = vadd.f32 1.0, %v2907_v21  ;;  %v2909_v42 = vpop.eup %2908 }
 0xa14   :  { %2910 = vrcp.f32 %v1128_v40 }
 0xa15   :  { %2912 = vpow2.f32 %v2400_v3  ;;  %v577_v3 = vadd.f32 %v3521_v45, %v3565_v14 }
 0xa1e   :  { %v2911_v59 = vpop.eup %2910 }
 0xa1f   :  { %v1139_v0 = vmul.f32 %v2911_v59, %v2909_v42  ;;  %v2913_v5 = vpop.eup %2912  ;;  %v1138_v10 = vmul.f32 %v2911_v59, %v1044_v31 }
 0xa20   :  { %v1135_v8 = vadd.f32 1.0, %v2913_v5 }
 0xa21   :  { %1141 = vrot.lane.b32.xlu0 %v1139_v0, %s3077_s4  ;;  %v575_v0 = vadd.f32 %v3519_v43, %v3562_v7 }
 0xa22   :  { %2914 = vrcp.f32 %v1135_v8 }
 0xa2c   :  { %v2915_v13 = vpop.eup %2914 }
 0xa93   :  { %v1142_v1 = vpop.permute.xlu0 %1141 }
 0xa94   :  { %v1144_v12 = vadd.f32 %v1142_v1, %v1138_v10 }
 0xa96   :  { %2916 = vtanh.f32 %v1144_v12 }
 0xaa0   :  { %v2917_v4 = vpop.eup %2916 }
 0xaa1   :  { %v1146_v19 = vmul.f32 %v2917_v4, %v2915_v13 }
 0xaa3   :  { %1148 = vrot.lane.b32.xlu1 %v1146_v19, %s3077_s4 }
 0xb15   :  { %v1149_v20 = vpop.permute.xlu1 %1148 }
 0xb16   :  { %2401 = vmatmul.mubr.msk.f32.vlgmr.msra.gmra.mrb[0].mxu1 %vm649_vm5, %v1149_v20 }
 0xb17   :  { %2618 = vmatpush1.bf16.msra.mxu1 %v3245_v41  ;;  %1316 = vmatprep.mubr.f32.mxu1 %v3074_v24 }
 0xb18   :  { %2620 = vmatprep.subr.bf16.mxu1 %v3288_v57 }
 0xb1b   :  { %2622 = vmatpush1.bf16.msra.mxu1 %v3296_v61 }
 0xb1c   :  { %2624 = vmatprep.subr.bf16.mxu1 %v3334_v11 }
 0xb1f   :  { %2626 = vmatpush1.bf16.msra.mxu1 %v3342_v15 }
 0xb20   :  { %2628 = vmatprep.subr.bf16.mxu1 %v3380_v22 }
 0xb23   :  { %2630 = vmatpush1.bf16.msra.mxu1 %v3388_v26 }
 0xb24   :  { %2632 = vmatprep.subr.bf16.mxu1 %v3237_v38 }
 0xbe9   :  { %v1218_v25 = vpop.f32.mrb[0].mxu1 }
 0xbea   :  { %v1223_v29 = vadd.f32 %v1218_v25, %v569_v23  ;;  %v1220_v30 = vpop.f32.mrb[1].mxu1 }
 0xbeb   :  { %v1224_v16 = vadd.f32 %v1220_v30, %v571_v9 }
 0xbec   :  { %v2402_v31 = vmul.f32 -1.442695, %v1223_v29 }
 0xbed   :  { %v2403_v36 = vmul.f32 -1.442695, %v1224_v16 }
 0xbee   :  { %2918 = vpow2.f32 %v2402_v31 }
 0xbef   :  { %2920 = vtanh.f32 %v1224_v16 }
 0xbf8   :  { %v2919_v32 = vpop.eup %2918 }
 0xbf9   :  { %v1228_v33 = vadd.f32 1.0, %v2919_v32  ;;  %v2921_v17 = vpop.eup %2920 }
 0xbfb   :  { %2922 = vrcp.f32 %v1228_v33 }
 0xbfc   :  { %2924 = vpow2.f32 %v2403_v36 }
 0xc05   :  { %v2923_v34 = vpop.eup %2922 }
 0xc06   :  { %v1239_v35 = vmul.f32 %v2923_v34, %v2921_v17  ;;  %v2925_v27 = vpop.eup %2924  ;;  %v1238_v28 = vmul.f32 %v2923_v34, %v1144_v12  ;;  %v581_v17 = vadd.f32 %v3523_v46, %v3562_v7  ;;  %v583_v34 = vadd.f32 %v3525_v47, %v3565_v14 }
 0xc07   :  { %v1235_v18 = vadd.f32 1.0, %v2925_v27 }
 0xc08   :  { %1241 = vrot.lane.b32.xlu0 %v1239_v35, %s3077_s4 }
 0xc09   :  { %2926 = vrcp.f32 %v1235_v18 }
 0xc13   :  { %v2927_v21 = vpop.eup %2926 }
 0xc7a   :  { %v1242_v37 = vpop.permute.xlu0 %1241 }
 0xc7b   :  { %v1244_v39 = vadd.f32 %v1242_v37, %v1238_v28 }
 0xc7d   :  { %2928 = vtanh.f32 %v1244_v39 }
 0xc87   :  { %v2929_v40 = vpop.eup %2928 }
 0xc88   :  { %v1246_v42 = vmul.f32 %v2929_v40, %v2927_v21 }
 0xc8a   :  { %1248 = vrot.lane.b32.xlu1 %v1246_v42, %s3077_s4 }
 0xcfc   :  { %v1249_v59 = vpop.permute.xlu1 %1248 }
 0xcfd   :  { %2404 = vmatmul.mubr.msk.f32.vlgmr.msra.gmra.mrb[2].mxu1 %vm649_vm5, %v1249_v59 }
 0xcfe   :  { %2634 = vmatpush1.bf16.msra.mxu1 %v3245_v41  ;;  %1416 = vmatprep.mubr.f32.mxu1 %v3074_v24 }
 0xcff   :  { %2636 = vmatprep.subr.bf16.mxu1 %v3288_v57 }
 0xd02   :  { %2638 = vmatpush1.bf16.msra.mxu1 %v3296_v61 }
 0xd03   :  { %2640 = vmatprep.subr.bf16.mxu1 %v3334_v11 }
 0xd06   :  { %2642 = vmatpush1.bf16.msra.mxu1 %v3342_v15 }
 0xd07   :  { %2644 = vmatprep.subr.bf16.mxu1 %v3380_v22 }
 0xd0a   :  { %2646 = vmatpush1.bf16.msra.mxu1 %v3388_v26 }
 0xd0b   :  { %2648 = vmatprep.subr.bf16.mxu1 %v3237_v38 }
 0xdd0   :  { %v1318_v5 = vpop.f32.mrb[2].mxu1 }
 0xdd1   :  { %v1323_v8 = vadd.f32 %v1318_v5, %v575_v0  ;;  %v1320_v10 = vpop.f32.mrb[3].mxu1 }
 0xdd2   :  { %v1324_v1 = vadd.f32 %v1320_v10, %v577_v3 }
 0xdd3   :  { %v2405_v12 = vmul.f32 -1.442695, %v1323_v8 }
 0xdd4   :  { %v2406_v9 = vmul.f32 -1.442695, %v1324_v1 }
 0xdd5   :  { %2930 = vpow2.f32 %v2405_v12 }
 0xdd6   :  { %2932 = vtanh.f32 %v1324_v1 }
 0xddf   :  { %v2931_v13 = vpop.eup %2930 }
 0xde0   :  { %v1328_v4 = vadd.f32 1.0, %v2931_v13  ;;  %v2933_v19 = vpop.eup %2932  ;;  %v587_v13 = vadd.f32 %v3527_v44, %v3562_v7 }
 0xde2   :  { %2934 = vrcp.f32 %v1328_v4  ;;  %v589_v4 = vadd.f32 %v3529_v48, %v3565_v14 }
 0xde3   :  { %2936 = vpow2.f32 %v2406_v9 }
 0xdec   :  { %v2935_v20 = vpop.eup %2934 }
 0xded   :  { %v1339_v23 = vmul.f32 %v2935_v20, %v2933_v19  ;;  %v2937_v43 = vpop.eup %2936  ;;  %v1338_v45 = vmul.f32 %v2935_v20, %v1244_v39 }
 0xdee   :  { %v1335_v25 = vadd.f32 1.0, %v2937_v43 }
 0xdef   :  { %1341 = vrot.lane.b32.xlu0 %v1339_v23, %s3077_s4 }
 0xdf0   :  { %2938 = vrcp.f32 %v1335_v25 }
 0xdfa   :  { %v2939_v16 = vpop.eup %2938 }
 0xe61   :  { %v1342_v29 = vpop.permute.xlu0 %1341 }
 0xe62   :  { %v1344_v30 = vadd.f32 %v1342_v29, %v1338_v45 }
 0xe64   :  { %2940 = vtanh.f32 %v1344_v30 }
 0xe6e   :  { %v2941_v31 = vpop.eup %2940 }
 0xe6f   :  { %v1346_v32 = vmul.f32 %v2941_v31, %v2939_v16 }
 0xe71   :  { %1348 = vrot.lane.b32.xlu1 %v1346_v32, %s3077_s4 }
 0xee3   :  { %v1349_v33 = vpop.permute.xlu1 %1348 }
 0xee4   :  { %2407 = vmatmul.mubr.msk.f32.vlgmr.msra.gmra.mrb[4].mxu1 %vm649_vm5, %v1349_v33 }
 0xee5   :  { %2650 = vmatpush1.bf16.msra.mxu1 %v3245_v41  ;;  %1516 = vmatprep.mubr.f32.mxu1 %v3074_v24 }
 0xee6   :  { %2652 = vmatprep.subr.bf16.mxu1 %v3288_v57 }
 0xee9   :  { %2654 = vmatpush1.bf16.msra.mxu1 %v3296_v61 }
 0xeea   :  { %2656 = vmatprep.subr.bf16.mxu1 %v3334_v11 }
 0xeed   :  { %2658 = vmatpush1.bf16.msra.mxu1 %v3342_v15 }
 0xeee   :  { %2660 = vmatprep.subr.bf16.mxu1 %v3380_v22 }
 0xef1   :  { %2662 = vmatpush1.bf16.msra.mxu1 %v3388_v26 }
 0xef2   :  { %2664 = vmatprep.subr.bf16.mxu1 %v3237_v38 }
 0xfb7   :  { %v1418_v35 = vpop.f32.mrb[4].mxu1 }
 0xfb8   :  { %v1423_v36 = vadd.f32 %v1418_v35, %v581_v17  ;;  %v1420_v27 = vpop.f32.mrb[5].mxu1 }
 0xfb9   :  { %v1424_v18 = vadd.f32 %v1420_v27, %v583_v34 }
 0xfba   :  { %v2408_v28 = vmul.f32 -1.442695, %v1423_v36 }
 0xfbb   :  { %v2409_v59 = vmul.f32 -1.442695, %v1424_v18 }
 0xfbc   :  { %2942 = vpow2.f32 %v2408_v28  ;;  %v595_v28 = vadd.f32 %v3533_v52, %v3565_v14 }
 0xfbd   :  { %2944 = vtanh.f32 %v1424_v18  ;;  %v593_v18 = vadd.f32 %v3531_v51, %v3562_v7 }
 0xfc6   :  { %v2943_v37 = vpop.eup %2942 }
 0xfc7   :  { %v1428_v39 = vadd.f32 1.0, %v2943_v37  ;;  %v2945_v21 = vpop.eup %2944 }
 0xfc9   :  { %2946 = vrcp.f32 %v1428_v39 }
 0xfca   :  { %2948 = vpow2.f32 %v2409_v59 }
 0xfd3   :  { %v2947_v40 = vpop.eup %2946 }
 0xfd4   :  { %v1439_v42 = vmul.f32 %v2947_v40, %v2945_v21  ;;  %v2949_v46 = vpop.eup %2948  ;;  %v1438_v47 = vmul.f32 %v2947_v40, %v1344_v30 }
 0xfd5   :  { %v1435_v0 = vadd.f32 1.0, %v2949_v46 }
 0xfd6   :  { %1441 = vrot.lane.b32.xlu0 %v1439_v42, %s3077_s4 }
 0xfd7   :  { %2950 = vrcp.f32 %v1435_v0 }
 0xfe1   :  { %v2951_v8 = vpop.eup %2950 }
0x1048   :  { %v1442_v3 = vpop.permute.xlu0 %1441 }
0x1049   :  { %v1444_v5 = vadd.f32 %v1442_v3, %v1438_v47 }
0x104b   :  { %2952 = vtanh.f32 %v1444_v5 }
0x1055   :  { %v2953_v10 = vpop.eup %2952 }
0x1056   :  { %v1446_v1 = vmul.f32 %v2953_v10, %v2951_v8 }
0x1058   :  { %1448 = vrot.lane.b32.xlu1 %v1446_v1, %s3077_s4 }
0x10ca   :  { %v1449_v12 = vpop.permute.xlu1 %1448 }
0x10cb   :  { %2410 = vmatmul.mubr.msk.f32.vlgmr.msra.gmra.mrb[6].mxu1 %vm649_vm5, %v1449_v12 }
0x10cc   :  { %2666 = vmatpush1.bf16.msra.mxu1 %v3245_v41  ;;  %1616 = vmatprep.mubr.f32.mxu1 %v3074_v24 }
0x10cd   :  { %2668 = vmatprep.subr.bf16.mxu1 %v3288_v57 }
0x10d0   :  { %2670 = vmatpush1.bf16.msra.mxu1 %v3296_v61 }
0x10d1   :  { %2672 = vmatprep.subr.bf16.mxu1 %v3334_v11 }
0x10d4   :  { %2674 = vmatpush1.bf16.msra.mxu1 %v3342_v15 }
0x10d5   :  { %2676 = vmatprep.subr.bf16.mxu1 %v3380_v22 }
0x10d8   :  { %2678 = vmatpush1.bf16.msra.mxu1 %v3388_v26 }
0x10d9   :  { %2680 = vmatprep.subr.bf16.mxu1 %v3237_v38 }
0x119e   :  { %v1518_v19 = vpop.f32.mrb[6].mxu1 }
0x119f   :  { %v1523_v20 = vadd.f32 %v1518_v19, %v587_v13  ;;  %v1520_v23 = vpop.f32.mrb[7].mxu1 }
0x11a0   :  { %v1524_v9 = vadd.f32 %v1520_v23, %v589_v4  ;;  %v601_v23 = vadd.f32 %v3537_v53, %v3565_v14 }
0x11a1   :  { %v2411_v43 = vmul.f32 -1.442695, %v1523_v20  ;;  %v599_v20 = vadd.f32 %v3535_v49, %v3562_v7 }
0x11a2   :  { %v2412_v31 = vmul.f32 -1.442695, %v1524_v9 }
0x11a3   :  { %2954 = vpow2.f32 %v2411_v43 }
0x11a4   :  { %2956 = vtanh.f32 %v1524_v9 }
0x11ad   :  { %v2955_v25 = vpop.eup %2954 }
0x11ae   :  { %v1528_v45 = vadd.f32 1.0, %v2955_v25  ;;  %v2957_v29 = vpop.eup %2956 }
0x11b0   :  { %2958 = vrcp.f32 %v1528_v45 }
0x11b1   :  { %2960 = vpow2.f32 %v2412_v31 }
0x11ba   :  { %v2959_v30 = vpop.eup %2958 }
0x11bb   :  { %v1539_v16 = vmul.f32 %v2959_v30, %v2957_v29  ;;  %v2961_v44 = vpop.eup %2960  ;;  %v1538_v48 = vmul.f32 %v2959_v30, %v1444_v5 }
0x11bc   :  { %v1535_v32 = vadd.f32 1.0, %v2961_v44 }
0x11bd   :  { %1541 = vrot.lane.b32.xlu0 %v1539_v16, %s3077_s4 }
0x11be   :  { %2962 = vrcp.f32 %v1535_v32 }
0x11c8   :  { %v2963_v34 = vpop.eup %2962 }
0x122f   :  { %v1542_v33 = vpop.permute.xlu0 %1541 }
0x1230   :  { %v1544_v17 = vadd.f32 %v1542_v33, %v1538_v48 }
0x1232   :  { %2964 = vtanh.f32 %v1544_v17 }
0x123c   :  { %v2965_v35 = vpop.eup %2964 }
0x123d   :  { %v1546_v36 = vmul.f32 %v2965_v35, %v2963_v34 }
0x123f   :  { %1548 = vrot.lane.b32.xlu1 %v1546_v36, %s3077_s4 }
0x12b1   :  { %v1549_v27 = vpop.permute.xlu1 %1548 }
0x12b2   :  { %2413 = vmatmul.mubr.msk.f32.vlgmr.msra.gmra.mrb[8].mxu1 %vm649_vm5, %v1549_v27 }
0x12b3   :  { %2682 = vmatpush1.bf16.msra.mxu1 %v3245_v41  ;;  %1716 = vmatprep.mubr.f32.mxu1 %v3074_v24 }
0x12b4   :  { %2684 = vmatprep.subr.bf16.mxu1 %v3288_v57 }
0x12b7   :  { %2686 = vmatpush1.bf16.msra.mxu1 %v3296_v61 }
0x12b8   :  { %2688 = vmatprep.subr.bf16.mxu1 %v3334_v11 }
0x12bb   :  { %2690 = vmatpush1.bf16.msra.mxu1 %v3342_v15 }
0x12bc   :  { %2692 = vmatprep.subr.bf16.mxu1 %v3380_v22 }
0x12bf   :  { %2694 = vmatpush1.bf16.msra.mxu1 %v3388_v26 }
0x12c0   :  { %2696 = vmatprep.subr.bf16.mxu1 %v3237_v38 }
0x1385   :  { %v1618_v37 = vpop.f32.mrb[8].mxu1 }
0x1386   :  { %v1623_v39 = vadd.f32 %v1618_v37, %v593_v18  ;;  %v1620_v21 = vpop.f32.mrb[9].mxu1  ;;  %v607_v37 = vadd.f32 %v3541_v56, %v3565_v14 }
0x1387   :  { %v1624_v40 = vadd.f32 %v1620_v21, %v595_v28  ;;  %v605_v28 = vadd.f32 %v3539_v54, %v3562_v7 }
0x1388   :  { %v2414_v42 = vmul.f32 -1.442695, %v1623_v39 }
0x1389   :  { %v2415_v5 = vmul.f32 -1.442695, %v1624_v40 }
0x138a   :  { %2966 = vpow2.f32 %v2414_v42 }
0x138b   :  { %2968 = vtanh.f32 %v1624_v40 }
0x1394   :  { %v2967_v59 = vpop.eup %2966 }
0x1395   :  { %v1628_v46 = vadd.f32 1.0, %v2967_v59  ;;  %v2969_v0 = vpop.eup %2968 }
0x1397   :  { %2970 = vrcp.f32 %v1628_v46 }
0x1398   :  { %2972 = vpow2.f32 %v2415_v5 }
0x13a1   :  { %v2971_v47 = vpop.eup %2970 }
0x13a2   :  { %v1639_v3 = vmul.f32 %v2971_v47, %v2969_v0  ;;  %v2973_v51 = vpop.eup %2972  ;;  %v1638_v52 = vmul.f32 %v2971_v47, %v1544_v17 }
0x13a3   :  { %v1635_v8 = vadd.f32 1.0, %v2973_v51 }
0x13a4   :  { %1641 = vrot.lane.b32.xlu0 %v1639_v3, %s3077_s4 }
0x13a5   :  { %2974 = vrcp.f32 %v1635_v8 }
0x13af   :  { %v2975_v12 = vpop.eup %2974 }
0x1416   :  { %v1642_v10 = vpop.permute.xlu0 %1641 }
0x1417   :  { %v1644_v1 = vadd.f32 %v1642_v10, %v1638_v52 }
0x1419   :  { %2976 = vtanh.f32 %v1644_v1 }
0x1423   :  { %v2977_v13 = vpop.eup %2976 }
0x1424   :  { %v1646_v4 = vmul.f32 %v2977_v13, %v2975_v12 }
0x1426   :  { %1648 = vrot.lane.b32.xlu1 %v1646_v4, %s3077_s4 }
0x1498   :  { %v1649_v19 = vpop.permute.xlu1 %1648 }
0x1499   :  { %2416 = vmatmul.mubr.msk.f32.vlgmr.msra.gmra.mrb[10].mxu1 %vm649_vm5, %v1649_v19  ;;  %v611_v19 = vadd.f32 %v3543_v50, %v3562_v7 }
0x149a   :  { %2698 = vmatpush1.bf16.msra.mxu1 %v3245_v41  ;;  %1816 = vmatprep.mubr.f32.mxu1 %v3074_v24 }
0x149b   :  { %2700 = vmatprep.subr.bf16.mxu1 %v3288_v57 }
0x149e   :  { %2702 = vmatpush1.bf16.msra.mxu1 %v3296_v61 }
0x149f   :  { %2704 = vmatprep.subr.bf16.mxu1 %v3334_v11 }
0x14a2   :  { %2706 = vmatpush1.bf16.msra.mxu1 %v3342_v15 }
0x14a3   :  { %2708 = vmatprep.subr.bf16.mxu1 %v3380_v22 }
0x14a6   :  { %2710 = vmatpush1.bf16.msra.mxu1 %v3388_v26 }
0x14a7   :  { %2712 = vmatprep.subr.bf16.mxu1 %v3237_v38 }
0x156c   :  { %v1718_v9 = vpop.f32.mrb[10].mxu1 }
0x156d   :  { %v1723_v43 = vadd.f32 %v1718_v9, %v599_v20  ;;  %v1720_v25 = vpop.f32.mrb[11].mxu1  ;;  %v613_v20 = vadd.f32 %v3545_v58, %v3565_v14 }
0x156e   :  { %v1724_v45 = vadd.f32 %v1720_v25, %v601_v23 }
0x156f   :  { %v2417_v29 = vmul.f32 -1.442695, %v1723_v43 }
0x1570   :  { %v2418_v48 = vmul.f32 -1.442695, %v1724_v45 }
0x1571   :  { %2978 = vpow2.f32 %v2417_v29 }
0x1572   :  { %2980 = vtanh.f32 %v1724_v45 }
0x157b   :  { %v2979_v30 = vpop.eup %2978 }
0x157c   :  { %v1728_v16 = vadd.f32 1.0, %v2979_v30  ;;  %v2981_v31 = vpop.eup %2980 }
0x157e   :  { %2982 = vrcp.f32 %v1728_v16 }
0x157f   :  { %2984 = vpow2.f32 %v2418_v48 }
0x1588   :  { %v2983_v44 = vpop.eup %2982 }
0x1589   :  { %v1739_v32 = vmul.f32 %v2983_v44, %v2981_v31  ;;  %v2985_v49 = vpop.eup %2984  ;;  %v1738_v53 = vmul.f32 %v2983_v44, %v1644_v1 }
0x158a   :  { %v1735_v33 = vadd.f32 1.0, %v2985_v49 }
0x158b   :  { %1741 = vrot.lane.b32.xlu0 %v1739_v32, %s3077_s4 }
0x158c   :  { %2986 = vrcp.f32 %v1735_v33 }
0x1596   :  { %v2987_v35 = vpop.eup %2986 }
0x15fd   :  { %v1742_v17 = vpop.permute.xlu0 %1741 }
0x15fe   :  { %v1744_v34 = vadd.f32 %v1742_v17, %v1738_v53 }
0x1600   :  { %2988 = vtanh.f32 %v1744_v34 }
0x160a   :  { %v2989_v36 = vpop.eup %2988 }
0x160b   :  { %v1746_v27 = vmul.f32 %v2989_v36, %v2987_v35  ;;  %v617_v36 = vadd.f32 %v3547_v60, %v3562_v7 }
0x160d   :  { %1748 = vrot.lane.b32.xlu1 %v1746_v27, %s3077_s4  ;;  %v619_v27 = vadd.f32 %v3549_v63, %v3565_v14 }
0x167f   :  { %v1749_v18 = vpop.permute.xlu1 %1748 }
0x1680   :  { %2419 = vmatmul.mubr.msk.f32.vlgmr.msra.gmra.mrb[12].mxu1 %vm649_vm5, %v1749_v18 }
0x1681   :  { %2714 = vmatpush1.bf16.msra.mxu1 %v3245_v41  ;;  %1916 = vmatprep.mubr.f32.mxu1 %v3074_v24 }
0x1682   :  { %2716 = vmatprep.subr.bf16.mxu1 %v3288_v57 }
0x1685   :  { %2718 = vmatpush1.bf16.msra.mxu1 %v3296_v61 }
0x1686   :  { %2720 = vmatprep.subr.bf16.mxu1 %v3334_v11 }
0x1689   :  { %2722 = vmatpush1.bf16.msra.mxu1 %v3342_v15 }
0x168a   :  { %2724 = vmatprep.subr.bf16.mxu1 %v3380_v22 }
0x168d   :  { %2726 = vmatpush1.bf16.msra.mxu1 %v3388_v26 }
0x168e   :  { %2728 = vmatprep.subr.bf16.mxu1 %v3237_v38 }
0x1753   :  { %v1818_v39 = vpop.f32.mrb[12].mxu1 }
0x1754   :  { %v1823_v21 = vadd.f32 %v1818_v39, %v605_v28  ;;  %v1820_v40 = vpop.f32.mrb[13].mxu1 }
0x1755   :  { %v1824_v42 = vadd.f32 %v1820_v40, %v607_v37 }
0x1756   :  { %v2420_v59 = vmul.f32 -1.442695, %v1823_v21 }
0x1757   :  { %v2421_v51 = vmul.f32 -1.442695, %v1824_v42 }
0x1758   :  { %2990 = vpow2.f32 %v2420_v59 }
0x1759   :  { %2992 = vtanh.f32 %v1824_v42 }
0x1762   :  { %v2991_v46 = vpop.eup %2990 }
0x1763   :  { %v1828_v0 = vadd.f32 1.0, %v2991_v46  ;;  %v2993_v47 = vpop.eup %2992 }
0x1765   :  { %2994 = vrcp.f32 %v1828_v0 }
0x1766   :  { %2996 = vpow2.f32 %v2421_v51 }
0x176f   :  { %v2995_v3 = vpop.eup %2994 }
0x1770   :  { %v1839_v5 = vmul.f32 %v2995_v3, %v2993_v47  ;;  %v2997_v54 = vpop.eup %2996  ;;  %v1838_v56 = vmul.f32 %v2995_v3, %v1744_v34 }
0x1771   :  { %v1835_v8 = vadd.f32 1.0, %v2997_v54 }
0x1772   :  { %1841 = vrot.lane.b32.xlu0 %v1839_v5, %s3077_s4 }
0x1773   :  { %2998 = vrcp.f32 %v1835_v8 }
0x177d   :  { %v2999_v1 = vpop.eup %2998 }
0x17e4   :  { %v1842_v52 = vpop.permute.xlu0 %1841 }
0x17e5   :  { %v1844_v10 = vadd.f32 %v1842_v52, %v1838_v56  ;;  %v623_v52 = vadd.f32 %v3551_v2, %v3562_v7 }
0x17e7   :  { %3000 = vtanh.f32 %v1844_v10 }
0x17f1   :  { %v3001_v12 = vpop.eup %3000 }
0x17f2   :  { %v1846_v13 = vmul.f32 %v3001_v12, %v2999_v1 }
0x17f4   :  { %1848 = vrot.lane.b32.xlu1 %v1846_v13, %s3077_s4 }
0x1866   :  { %v1849_v4 = vpop.permute.xlu1 %1848 }
0x1867   :  { %2422 = vmatmul.mubr.msk.f32.vlgmr.msra.gmra.mrb[14].mxu1 %vm649_vm5, %v1849_v4 }
0x1868   :  { %2730 = vmatpush1.bf16.msra.mxu1 %v3245_v41  ;;  %2016 = vmatprep.mubr.f32.mxu1 %v3074_v24 }
0x1869   :  { %2732 = vmatprep.subr.bf16.mxu1 %v3288_v57 }
0x186c   :  { %2734 = vmatpush1.bf16.msra.mxu1 %v3296_v61 }
0x186d   :  { %2736 = vmatprep.subr.bf16.mxu1 %v3334_v11 }
0x1870   :  { %2738 = vmatpush1.bf16.msra.mxu1 %v3342_v15 }
0x1871   :  { %2740 = vmatprep.subr.bf16.mxu1 %v3380_v22 }
0x1874   :  { %2742 = vmatpush1.bf16.msra.mxu1 %v3388_v26 }
0x1875   :  { %2744 = vmatprep.subr.bf16.mxu1 %v3237_v38 }
0x193a   :  { %v1918_v23 = vpop.f32.mrb[14].mxu1 }
0x193b   :  { %v1923_v9 = vadd.f32 %v1918_v23, %v611_v19  ;;  %v1920_v43 = vpop.f32.mrb[15].mxu1 }
0x193c   :  { %v1924_v25 = vadd.f32 %v1920_v43, %v613_v20 }
0x193d   :  { %v2423_v45 = vmul.f32 -1.442695, %v1923_v9 }
0x193e   :  { %v2424_v32 = vmul.f32 -1.442695, %v1924_v25 }
0x193f   :  { %3002 = vpow2.f32 %v2423_v45 }
0x1940   :  { %3004 = vtanh.f32 %v1924_v25 }
0x1949   :  { %v3003_v29 = vpop.eup %3002 }
0x194a   :  { %v1928_v30 = vadd.f32 1.0, %v3003_v29  ;;  %v3005_v16 = vpop.eup %3004  ;;  %v629_v29 = vadd.f32 %v3558_v6, %v3562_v7  ;;  %v2247_v6 = vld [vmem:[%s3829_s6] sm:$0xff]  ;;  %v2249_v7 = vld [vmem:[%s3829_s6 + $0x10] sm:$0xff] }
0x194c   :  { %3006 = vrcp.f32 %v1928_v30  ;;  %v631_v30 = vadd.f32 %v3560_v62, %v3565_v14  ;;  %v2248_v62 = vld [vmem:[%s3829_s6 + $0x8] sm:$0xff] }
0x194d   :  { %3008 = vpow2.f32 %v2424_v32 }
0x1956   :  { %v3007_v31 = vpop.eup %3006 }
0x1957   :  { %v1939_v44 = vmul.f32 %v3007_v31, %v3005_v16  ;;  %v3009_v50 = vpop.eup %3008  ;;  %v1938_v58 = vmul.f32 %v3007_v31, %v1844_v10 }
0x1958   :  { %v1935_v48 = vadd.f32 1.0, %v3009_v50 }
0x1959   :  { %1941 = vrot.lane.b32.xlu0 %v1939_v44, %s3077_s4 }
0x195a   :  { %3010 = vrcp.f32 %v1935_v48 }
0x1964   :  { %v3011_v53 = vpop.eup %3010 }
0x19cb   :  { %v1942_v49 = vpop.permute.xlu0 %1941 }
0x19cc   :  { %v1944_v33 = vadd.f32 %v1942_v49, %v1938_v58 }
0x19ce   :  { %3012 = vtanh.f32 %v1944_v33 }
0x19d8   :  { %v3013_v17 = vpop.eup %3012 }
0x19d9   :  { %v1946_v34 = vmul.f32 %v3013_v17, %v3011_v53  ;;  %v2776_v17 = vpack.c.bf16 %v2248_v62, %v2247_v6 }
0x19db   :  { %1948 = vrot.lane.b32.xlu1 %v1946_v34, %s3077_s4  ;;  %v2250_v34 = vld [vmem:[%s3829_s6 + $0x18] sm:$0xff] }
0x1a4d   :  { %v1949_v35 = vpop.permute.xlu1 %1948 }
0x1a4e   :  { %2425 = vmatmul.mubr.msk.f32.vlgmr.msra.gmra.mrb[16].mxu1 %vm649_vm5, %v1949_v35  ;;  %v2779_v35 = vpack.c.bf16 %v2250_v34, %v2249_v7 }
0x1a4f   :  { %2746 = vmatpush1.bf16.msra.mxu1 %v3245_v41  ;;  %2116 = vmatprep.mubr.f32.mxu1 %v3074_v24 }
0x1a50   :  { %2748 = vmatprep.subr.bf16.mxu1 %v3288_v57 }
0x1a53   :  { %2750 = vmatpush1.bf16.msra.mxu1 %v3296_v61 }
0x1a54   :  { %2752 = vmatprep.subr.bf16.mxu1 %v3334_v11 }
0x1a57   :  { %2754 = vmatpush1.bf16.msra.mxu1 %v3342_v15 }
0x1a58   :  { %2756 = vmatprep.subr.bf16.mxu1 %v3380_v22 }
0x1a5b   :  { %2758 = vmatpush1.bf16.msra.mxu1 %v3388_v26 }
0x1a5c   :  { %2760 = vmatprep.subr.bf16.mxu1 %v3237_v38 }
0x1b21   :  { %v2018_v18 = vpop.f32.mrb[16].mxu1 }
0x1b22   :  { %v2023_v28 = vadd.f32 %v2018_v18, %v617_v36  ;;  %v2020_v37 = vpop.f32.mrb[17].mxu1  ;;  %v2251_v36 = vld [vmem:[%s3829_s6 + $0x20] sm:$0xff] }
0x1b23   :  { %v2024_v39 = vadd.f32 %v2020_v37, %v619_v27  ;;  %v2252_v27 = vld [vmem:[%s3829_s6 + $0x28] sm:$0xff] }
0x1b24   :  { %v2426_v21 = vmul.f32 -1.442695, %v2023_v28  ;;  %v2782_v18 = vpack.c.bf16 %v2252_v27, %v2251_v36  ;;  %v2253_v28 = vld [vmem:[%s3829_s6 + $0x30] sm:$0xff] }
0x1b25   :  { %v2427_v38 = vmul.f32 -1.442695, %v2024_v39 }
0x1b26   :  { %3014 = vpow2.f32 %v2426_v21 }
0x1b27   :  { %3016 = vtanh.f32 %v2024_v39 }
0x1b30   :  { %v3015_v40 = vpop.eup %3014 }
0x1b31   :  { %v2028_v42 = vadd.f32 1.0, %v3015_v40  ;;  %v3017_v59 = vpop.eup %3016 }
0x1b33   :  { %3018 = vrcp.f32 %v2028_v42 }
0x1b34   :  { %3020 = vpow2.f32 %v2427_v38 }
0x1b3d   :  { %v3019_v46 = vpop.eup %3018 }
0x1b3e   :  { %v2039_v0 = vmul.f32 %v3019_v46, %v3017_v59  ;;  %v3021_v60 = vpop.eup %3020  ;;  %v2038_v63 = vmul.f32 %v3019_v46, %v1944_v33 }
0x1b3f   :  { %v2035_v47 = vadd.f32 1.0, %v3021_v60 }
0x1b40   :  { %2041 = vrot.lane.b32.xlu0 %v2039_v0, %s3077_s4 }
0x1b41   :  { %3022 = vrcp.f32 %v2035_v47 }
0x1b4b   :  { %v3023_v51 = vpop.eup %3022 }
0x1bb2   :  { %v2042_v3 = vpop.permute.xlu0 %2041 }
0x1bb3   :  { %v2044_v5 = vadd.f32 %v2042_v3, %v2038_v63  ;;  %v2434_v63 = vld [vmem:[%s3830_s7] ss:$0 sm:$0xff] }
0x1bb5   :  { %3024 = vtanh.f32 %v2044_v5 }
0x1bbf   :  { %v3025_v54 = vpop.eup %3024 }
0x1bc0   :  { %v2046_v8 = vmul.f32 %v3025_v54, %v3023_v51 }
0x1bc2   :  { %2048 = vrot.lane.b32.xlu1 %v2046_v8, %s3077_s4 }
0x1c34   :  { %v2049_v56 = vpop.permute.xlu1 %2048 }
0x1c35   :  { %2428 = vmatmul.mubr.msk.f32.vlgmr.msra.gmra.mrb[18].mxu1 %vm649_vm5, %v2049_v56 }
0x1c36   :  { %2762 = vmatpush1.bf16.msra.mxu1 %v3245_v41  ;;  %2216 = vmatprep.mubr.f32.mxu1 %v3074_v24  ;;  %v625_v41 = vadd.f32 %v3553_v55, %v3565_v14  ;;  %v3078_v14 = vmov 0.0|0.0   ;;  %v2254_v24 = vld [vmem:[%s3829_s6 + $0x38] sm:$0xff] }
0x1c37   :  { %2764 = vmatprep.subr.bf16.mxu1 %v3288_v57  ;;  %2775 = vmatprep.subr.bf16.mxu0 %v3078_v14  ;;  %v2785_v37 = vpack.c.bf16 %v2254_v24, %v2253_v28 }
0x1c38   :  { %2777 = vmatpush3.bf16.msra.mxu0 %v2776_v17 }
0x1c39   :  { %2778 = vmatprep.subr.bf16.mxu0 %v3078_v14 }
0x1c3a   :  { %2766 = vmatpush1.bf16.msra.mxu1 %v3296_v61 }
0x1c3b   :  { %2768 = vmatprep.subr.bf16.mxu1 %v3334_v11 }
0x1c3c   :  { %2780 = vmatpush3.bf16.msra.mxu0 %v2779_v35 }
0x1c3d   :  { %2781 = vmatprep.subr.bf16.mxu0 %v3078_v14 }
0x1c3e   :  { %2770 = vmatpush1.bf16.msra.mxu1 %v3342_v15 }
0x1c3f   :  { %2772 = vmatprep.subr.bf16.mxu1 %v3380_v22 }
0x1c40   :  { %2783 = vmatpush3.bf16.msra.mxu0 %v2782_v18 }
0x1c41   :  { %2784 = vmatprep.subr.bf16.mxu0 %v3078_v14 }
0x1c42   :  { %2774 = vmatpush1.bf16.msra.mxu1 %v3388_v26 }
0x1c44   :  { %2786 = vmatpush3.bf16.msra.mxu0 %v2785_v37 }
0x1d08   :  { %v2118_v10 = vpop.f32.mrb[18].mxu1 }
0x1d09   :  { %v2123_v1 = vadd.f32 %v2118_v10, %v623_v52  ;;  %v2120_v12 = vpop.f32.mrb[19].mxu1 }
0x1d0a   :  { %v2124_v57 = vadd.f32 %v2120_v12, %v625_v41 }
0x1d0b   :  { %v2429_v13 = vmul.f32 -1.442695, %v2123_v1 }
0x1d0c   :  { %v2430_v26 = vmul.f32 -1.442695, %v2124_v57 }
0x1d0d   :  { %3026 = vpow2.f32 %v2429_v13 }
0x1d0e   :  { %3028 = vtanh.f32 %v2124_v57 }
0x1d17   :  { %v3027_v61 = vpop.eup %3026 }
0x1d18   :  { %v2128_v11 = vadd.f32 1.0, %v3027_v61  ;;  %v3029_v15 = vpop.eup %3028 }
0x1d1a   :  { %3030 = vrcp.f32 %v2128_v11 }
0x1d1b   :  { %3032 = vpow2.f32 %v2430_v26 }
0x1d24   :  { %v3031_v22 = vpop.eup %3030 }
0x1d25   :  { %v2139_v4 = vmul.f32 %v3031_v22, %v3029_v15  ;;  %v3033_v2 = vpop.eup %3032  ;;  %v2138_v55 = vmul.f32 %v3031_v22, %v2044_v5 }
0x1d26   :  { %v2135_v19 = vadd.f32 1.0, %v3033_v2 }
0x1d27   :  { %2141 = vrot.lane.b32.xlu0 %v2139_v4, %s3077_s4 }
0x1d28   :  { %3034 = vrcp.f32 %v2135_v19 }
0x1d32   :  { %v3035_v9 = vpop.eup %3034 }
0x1d99   :  { %v2142_v20 = vpop.permute.xlu0 %2141 }
0x1d9a   :  { %v2144_v23 = vadd.f32 %v2142_v20, %v2138_v55 }
0x1d9c   :  { %3036 = vtanh.f32 %v2144_v23 }
0x1da6   :  { %v3037_v43 = vpop.eup %3036 }
0x1da7   :  { %v2146_v25 = vmul.f32 %v3037_v43, %v3035_v9 }
0x1da9   :  { %2148 = vrot.lane.b32.xlu1 %v2146_v25, %s3077_s4 }
0x1e1b   :  { %v2149_v45 = vpop.permute.xlu1 %2148 }
0x1e1c   :  { %2431 = vmatmul.mubr.msk.f32.vlgmr.msra.gmra.mrb[20].mxu1 %vm649_vm5, %v2149_v45 }
0x1eef   :  { %v2218_v16 = vpop.f32.mrb[20].mxu1 }
0x1ef0   :  { %v2223_v31 = vadd.f32 %v2218_v16, %v629_v29  ;;  %v2220_v44 = vpop.f32.mrb[21].mxu1 }
0x1ef1   :  { %v2224_v32 = vadd.f32 %v2220_v44, %v631_v30 }
0x1ef2   :  { %v2432_v50 = vmul.f32 -1.442695, %v2223_v31 }
0x1ef3   :  { %v2433_v39 = vmul.f32 -1.442695, %v2224_v32 }
0x1ef4   :  { %3038 = vpow2.f32 %v2432_v50 }
0x1ef5   :  { %3040 = vtanh.f32 %v2224_v32 }
0x1efe   :  { %v3039_v48 = vpop.eup %3038 }
0x1eff   :  { %v2228_v58 = vadd.f32 1.0, %v3039_v48  ;;  %v3041_v49 = vpop.eup %3040 }
0x1f01   :  { %3042 = vrcp.f32 %v2228_v58 }
0x1f02   :  { %3044 = vpow2.f32 %v2433_v39 }
0x1f0b   :  { %v3043_v33 = vpop.eup %3042 }
0x1f0c   :  { %v2239_v53 = vmul.f32 %v3043_v33, %v3041_v49  ;;  %v3045_v21 = vpop.eup %3044  ;;  %v2238_v42 = vmul.f32 %v3043_v33, %v2144_v23 }
0x1f0d   :  { %v2235_v40 = vadd.f32 1.0, %v3045_v21 }
0x1f0e   :  { %2241 = vrot.lane.b32.xlu0 %v2239_v53, %s3077_s4 }
0x1f0f   :  { %3046 = vrcp.f32 %v2235_v40 }
0x1f19   :  { %v3047_v0 = vpop.eup %3046 }
0x1f80   :  { %v2242_v59 = vpop.permute.xlu0 %2241 }
0x1f81   :  { %v2244_v46 = vadd.f32 %v2242_v59, %v2238_v42 }
0x1f83   :  { %3048 = vtanh.f32 %v2244_v46 }
0x1f8d   :  { %v3049_v38 = vpop.eup %3048 }
0x1f8e   :  { %v2246_v60 = vmul.f32 %v3049_v38, %v3047_v0 }
0x1f90   :  { %2263 = vrot.lane.b32.xlu1 %v2246_v60, %s3077_s4 }
0x2002   :  { %v2264_v47 = vpop.permute.xlu1 %2263 }
0x2003   :  { %2505 = vmatmul.mubr.msk.f32.vlgmr.msra.gmra.mrb[48].mxu0 %vm649_vm5, %v2264_v47 }
0x20d6   :  { %v2333_v3 = vpop.f32.mrb[48].mxu0 }
0x20d7   :  { %v2334_v5 = vadd.f32 %v2434_v63, %v2333_v3  ;;  %v2506_v51 = vpop.f32.mrb[49].mxu0 }
0x20d9   :  { %2338 = vst.msk [vmem:[#allocation2] sm:$0x3] %vm2337_vm7, %v2334_v5 }
0x20da   :  { %3061 = shalt.err (!%p3058_p4)
}
0x20db   :  { %s3062_s3 = scalar_lea.hbm %s3831_s8, 32 }
0x20dc   :  { %p3063_p5 = scmp.ne.s32.totalorder %s3831_s8, %s3062_s3  ;;  %p3066_p6 = scmp.lt.u32.totalorder %s3062_s3, %s3831_s8 }
0x20de   :  { %p3068_p7 = pnand %p3066_p6, %p3063_p5 }
0x20e0   :  { %3071 = shalt.err (!%p3068_p7)
}
0x20e1   :  { %2348 = dma.vmem_to_hbm [thread:$0]  %s2346_s18, 32, %s3831_s8, [#allocation3]  }
0x20e2   :  { %3072 = dma.done.wait [#allocation3], 32  }
0x20e3   :  { %3073 = vsyncadd [#allocation3], 4294967264 }
0x20e4   :  { %2352 = vsyncpa [#allocation3], 1 }

</bundles_post_ra>
